<compile_context>
chip_gen: v7x
topology: tpu7x:2x2x1
jax: 0.10.0
libtpu: 0.0.40
codegen_flags: <defaults>
</compile_context>

<pallas_src>
import functools

import jax
import jax.numpy as jnp
from jax import lax
from jax.experimental import pallas as pl
from jax.experimental.pallas import tpu as pltpu

BN_EPS = 1e-5


def _softplus(v):
    # PyTorch nn.Softplus (beta=1): numerically stable log(1 + exp(v)).
    return jnp.maximum(v, 0.0) + jnp.log1p(jnp.exp(-jnp.abs(v)))


# ------------------------------ chip defaults ---------------------------------
def _chip_defaults():
    """Returns (bf16_activations_ok, vmem_capacity_bytes, is_v7)."""
    try:
        kind = jax.devices()[0].device_kind.lower()
    except Exception:
        kind = ""
    is_v7 = "v7" in kind
    # bf16 VPU/EUP exists on v6e and newer; keep f32 activations on v5e/older.
    bf16_ok = ("v6" in kind) or is_v7
    try:
        vmem_cap = int(pltpu.get_tpu_info().vmem_capacity_bytes)
    except Exception:
        vmem_cap = (64 << 20) if is_v7 else (128 << 20)
    return bf16_ok, vmem_cap, is_v7


# --------------------------------- kernels ------------------------------------
def _proj_kernel(x_ref, wc_ref, wn_ref, b_ref, t1_ref, y_ref):
    """Center / neighbor projections, lane-dense [filter|core] 2F layout."""
    xv = x_ref[...]
    t1_ref[...] = jnp.dot(xv, wc_ref[...],
                          preferred_element_type=jnp.float32) + b_ref[...]
    y_ref[...] = jnp.dot(xv, wn_ref[...], preferred_element_type=jnp.float32)


def _apply_kernel(t1_ref, y_ref, adj_ref, w3_ref, nbr_ref, *, compute_dtype):
    """BN1-folded gated tile -> sigmoid*softplus gate -> neighbor sum."""
    f = nbr_ref.shape[-1]
    t1 = t1_ref[0]                                   # (ti, 2F), BN1 folded in
    y = y_ref[0]                                     # (N,  2F), BN1 folded in
    adj = adj_ref[0]                                 # (ti, N)
    w3 = w3_ref[0]                                   # (2F,),    BN1 folded in
    a1 = jnp.where(adj > 1.0, 1.0, adj)              # adj_ones[adj > 1] = 1
    g = (t1[:, None, :] + a1[:, :, None] * y[None, :, :]
         + adj[:, :, None] * w3[None, None, :])      # (ti, N, 2F) f32
    # bf16 on v6e/v7x (~2x VPU/EUP throughput on the gate stage), f32 on v5e.
    g = g.astype(compute_dtype)
    # One shared exp(-|g|) pass over the lane-dense 2F tile feeds BOTH the
    # sigmoid (filter half) and the softplus (core half).
    e = jnp.exp(-jnp.abs(g))
    sig = jnp.where(g >= 0.0, 1.0, e) / (1.0 + e)    # sigmoid(g), all lanes
    sp = jnp.maximum(g, 0.0) + jnp.log1p(e)          # softplus(g), all lanes
    two_f = g.shape[-1]
    if two_f % 128 == 0:
        # Lane-dense combine: rotate the core half into the filter lanes
        # (XLU has slack); lanes [0, F) of the product are sigmoid*softplus.
        act = (sig * pltpu.roll(sp, f, 2))[..., :f]
    else:
        act = sig[..., :f] * sp[..., f:]             # fallback for 2F % 128 != 0
    nbr_ref[...] = jnp.sum(act.astype(jnp.float32), axis=1)[None]


def _finalize_kernel(x_ref, nbr_ref, p_ref, o_ref):
    # Folded BN2 FMA + residual + softplus on a lane-dense slab.
    v = x_ref[...] + nbr_ref[...] * p_ref[0] + p_ref[1]
    o_ref[...] = _softplus(v).astype(o_ref.dtype)


# ------------------------------- tile pickers ----------------------------------
def _pick_row_tile(m):
    for t in (1024, 512, 256, 128, 64, 32, 16, 8):
        if t <= m and m % t == 0:
            return t
    return m


def _pick_i_tile(n, two_f, budget_bytes):
    for t in (512, 256, 128, 64, 32, 16, 8):
        if t <= n and n % t == 0 and t * n * two_f * 4 <= budget_bytes:
            return t
    return n


# --------------------------------- wrapper -------------------------------------
def conv_layer_forward(x, adj, W, b, bn1_gamma, bn1_beta, bn2_gamma, bn2_beta,
                       *, compute_dtype=None):
    """Training-mode ConvLayer forward.  x: (N0, N, F), adj: (N0, N, N)."""
    # TODO(synk): BatchNorm running_mean/running_var buffer updates (in-place
    # module state) are not reproduced; the forward output does not use them.
    N0, N, F = x.shape
    two_f = 2 * F
    M = N0 * N
    x = x.astype(jnp.float32)
    # TODO(synk): pass adj as int8 (values 0..2) and upcast in-kernel to cut
    # adjacency HBM traffic 4x (biggest relative win on v5e).
    adj = adj.astype(jnp.float32)

    bf16_ok, vmem_cap, is_v7 = _chip_defaults()
    if compute_dtype is None:
        compute_dtype = jnp.bfloat16 if bf16_ok else jnp.float32

    # fc_full(concat[x_i, adj_ones*x_j, adj]) decomposed; output channels stay
    # in their natural lane-dense [filter | core] order (width 2F).
    W = W.astype(jnp.float32)
    w_c = W[:, :F].T                          # (F, 2F)   center projection
    w_n = W[:, F:two_f].T                     # (F, 2F)   neighbor projection
    w3 = W[:, two_f]                          # (2F,)     adjacency coefficient
    bias = b.astype(jnp.float32)[None, :]     # (1, 2F)

    tm = _pick_row_tile(M)

    # --- 1) projection matmuls (lane-dense 2F outputs, no mid-vreg slicing) ---
    x2d = x.reshape(M, F)
    t1, y = pl.pallas_call(
        _proj_kernel,
        out_shape=[jax.ShapeDtypeStruct((M, two_f), jnp.float32)] * 2,
        grid=(M // tm,),
        in_specs=[pl.BlockSpec((tm, F), lambda i: (i, 0)),
                  pl.BlockSpec((F, two_f), lambda i: (0, 0)),
                  pl.BlockSpec((F, two_f), lambda i: (0, 0)),
                  pl.BlockSpec((1, two_f), lambda i: (0, 0))],
        out_specs=[pl.BlockSpec((tm, two_f), lambda i: (i, 0))] * 2,
        compiler_params=pltpu.CompilerParams(
            dimension_semantics=("parallel",)),
    )(x2d, w_c, w_n, bias)
    t1 = t1.reshape(N0, N, two_f)
    y = y.reshape(N0, N, two_f)

    # --- 2) BN1 batch statistics, computed ANALYTICALLY (no streaming pass) ---
    # gated[b,i,j,:] = t1[b,i,:] + a1[b,i,j]*y[b,j,:] + adj[b,i,j]*w3[:]
    a1 = jnp.where(adj > 1.0, 1.0, adj)
    cs1 = jnp.sum(a1, axis=1)                       # (N0, N)   sum_i a1
    cs1sq = jnp.sum(a1 * a1, axis=1)
    csa1a = jnp.sum(a1 * adj, axis=1)
    rs_a = jnp.sum(adj, axis=2)                     # (N0, N)   sum_j adj
    sa = jnp.sum(adj)
    sa2 = jnp.sum(adj * adj)
    cnt1 = float(N0 * N * N)
    hp = lax.Precision.HIGHEST

    s1 = (N * jnp.sum(t1, axis=(0, 1))
          + jnp.einsum('bj,bjc->c', cs1, y, precision=hp)
          + sa * w3)
    mean1 = s1 / cnt1                                # (2F,)
    # Mean-centered sum of squares (avoids E[x^2]-E[x]^2 cancellation): the
    # gated tensor is affine in t1, so centering t1 centers the whole tensor.
    t1c = t1 - mean1
    a1y = jnp.einsum('bij,bjc->bic', a1, y, precision=hp)
    q1 = (N * jnp.sum(t1c * t1c, axis=(0, 1))
          + jnp.einsum('bj,bjc->c', cs1sq, y * y, precision=hp)
          + sa2 * (w3 * w3)
          + 2.0 * jnp.sum(t1c * a1y, axis=(0, 1))
          + 2.0 * w3 * jnp.einsum('bi,bic->c', rs_a, t1c, precision=hp)
          + 2.0 * w3 * jnp.einsum('bj,bjc->c', csa1a, y, precision=hp))
    var1 = jnp.maximum(q1 / cnt1, 0.0)

    scale1 = bn1_gamma.astype(jnp.float32) * lax.rsqrt(var1 + BN_EPS)
    shift1 = bn1_beta.astype(jnp.float32) - mean1 * scale1
    # Fold BN1 into the small operands: gated_bn = t1p[i] + a1*yp[j] + adj*w3p.
    t1p = t1 * scale1 + shift1
    yp = y * scale1
    w3p = (w3 * scale1)[None, :]                     # (1, 2F)

    # --- 3) gated tile + sigmoid*softplus + neighbor sum (hot kernel) ---------
    tile_budget = (3 << 20) if is_v7 else (12 << 20)   # per (ti, N, 2F) f32 tile
    ti = _pick_i_tile(N, two_f, tile_budget)
    if is_v7 and (N0 * (N // ti)) % 2 == 1 and ti >= 16 and N % (ti // 2) == 0:
        ti //= 2                  # keep grid even across the two TensorCores
    n_it = N // ti
    est = (4 * ti * N * two_f * 4                       # in-kernel temporaries
           + 2 * (ti * two_f + N * two_f + ti * N) * 4  # double-buffered inputs
           + 2 * ti * F * 4)                            # double-buffered output
    vlim = int(min(max(2 * est, 32 << 20), int(0.75 * vmem_cap)))

    nbr = pl.pallas_call(
        functools.partial(_apply_kernel, compute_dtype=compute_dtype),
        out_shape=jax.ShapeDtypeStruct((N0, N, F), jnp.float32),
        grid=(N0, n_it),
        in_specs=[pl.BlockSpec((1, ti, two_f), lambda bb, ii: (bb, ii, 0)),
                  pl.BlockSpec((1, N, two_f), lambda bb, ii: (bb, 0, 0)),
                  pl.BlockSpec((1, ti, N), lambda bb, ii: (bb, ii, 0)),
                  pl.BlockSpec((1, two_f), lambda bb, ii: (0, 0))],
        out_specs=pl.BlockSpec((1, ti, F), lambda bb, ii: (bb, ii, 0)),
        compiler_params=pltpu.CompilerParams(
            dimension_semantics=("parallel", "parallel"),
            vmem_limit_bytes=vlim),
    )(t1p, yp, adj, w3p)

    # --- 4) BN2 stats (small, plain-JAX, two-pass centered) -------------------
    nbr2d = nbr.reshape(M, F)
    mean2 = jnp.mean(nbr2d, axis=0)
    var2 = jnp.mean(jnp.square(nbr2d - mean2), axis=0)
    scale2 = bn2_gamma.astype(jnp.float32) * lax.rsqrt(var2 + BN_EPS)
    shift2 = bn2_beta.astype(jnp.float32) - mean2 * scale2
    bn2p = jnp.stack([scale2, shift2], axis=0)           # (2, F)

    # --- 5) folded BN2 + residual + softplus, lane-dense slab -----------------
    if F < 128 and 128 % F == 0 and (M * F) % 128 == 0:
        lanes = 128
        rows = (M * F) // lanes
        x_slab = x2d.reshape(rows, lanes)
        n_slab = nbr2d.reshape(rows, lanes)
        p_slab = jnp.tile(bn2p, (1, lanes // F))          # channel-wrap matches
    else:
        rows, lanes = M, F
        x_slab, n_slab, p_slab = x2d, nbr2d, bn2p
    tr = _pick_row_tile(rows)
    out_slab = pl.pallas_call(
        _finalize_kernel,
        out_shape=jax.ShapeDtypeStruct((rows, lanes), x.dtype),
        grid=(rows // tr,),
        in_specs=[pl.BlockSpec((tr, lanes), lambda i: (i, 0)),
                  pl.BlockSpec((tr, lanes), lambda i: (i, 0)),
                  pl.BlockSpec((2, lanes), lambda i: (0, 0))],
        out_specs=pl.BlockSpec((tr, lanes), lambda i: (i, 0)),
        compiler_params=pltpu.CompilerParams(
            dimension_semantics=("parallel",)),
    )(x_slab, n_slab, p_slab)
    return out_slab.reshape(N0, N, F)


# ------------------------------ pure-JAX reference -----------------------------
def _reference(x, adj, W, b, g1, b1, g2, b2):
    """Transcription of the PyTorch forward (training-mode BatchNorm)."""
    N0, N, F = x.shape
    adj_ones = jnp.where(adj > 1.0, 1.0, adj)
    fea_j = jnp.broadcast_to(x[:, None, :, :], (N0, N, N, F))
    fea_i = jnp.broadcast_to(x[:, :, None, :], (N0, N, N, F))
    total = jnp.concatenate(
        [fea_i, adj_ones[..., None] * fea_j, adj[..., None]], axis=3)
    gated = total @ W.T + b
    m1 = gated.mean(axis=(0, 1, 2))
    v1 = ((gated - m1) ** 2).mean(axis=(0, 1, 2))
    gated = (gated - m1) / jnp.sqrt(v1 + BN_EPS) * g1 + b1
    filt = jax.nn.sigmoid(gated[..., :F])
    core = jax.nn.softplus(gated[..., F:])
    s = jnp.sum(filt * core, axis=2)
    m2 = s.mean(axis=(0, 1))
    v2 = ((s - m2) ** 2).mean(axis=(0, 1))
    s = (s - m2) / jnp.sqrt(v2 + BN_EPS) * g2 + b2
    return jax.nn.softplus(x + s)


if __name__ == "__main__":
    N0, N, F = 2, 16, 64          # structures per batch, atoms, atom_fea_len
    key = jax.random.PRNGKey(0)
    kx, ka, kw, kb, k1, k2, k3, k4 = jax.random.split(key, 8)

    x = jax.random.normal(kx, (N0, N, F), dtype=jnp.float32)
    # adjacency with small non-negative integer entries (0/1/2)
    adj = jax.random.randint(ka, (N0, N, N), 0, 3).astype(jnp.float32)

    # fc_full = nn.Linear(2F+1, 2F) with PyTorch-style uniform init.
    fan_in = 2 * F + 1
    bound = 1.0 / (fan_in ** 0.5)
    W = jax.random.uniform(kw, (2 * F, fan_in), minval=-bound, maxval=bound,
                           dtype=jnp.float32)
    b = jax.random.uniform(kb, (2 * F,), minval=-bound, maxval=bound,
                           dtype=jnp.float32)

    # Non-trivial BN affine params to exercise the folded scale/shift path.
    g1 = 1.0 + 0.1 * jax.random.normal(k1, (2 * F,), dtype=jnp.float32)
    b1 = 0.1 * jax.random.normal(k2, (2 * F,), dtype=jnp.float32)
    g2 = 1.0 + 0.1 * jax.random.normal(k3, (F,), dtype=jnp.float32)
    b2 = 0.1 * jax.random.normal(k4, (F,), dtype=jnp.float32)

    # bf16 activation math on v6e/v7x, f32 on v5e and older.
    use_bf16 = _chip_defaults()[0]
    cdtype = jnp.bfloat16 if use_bf16 else jnp.float32

    fwd = jax.jit(functools.partial(conv_layer_forward, W=W, b=b,
                                    bn1_gamma=g1, bn1_beta=b1,
                                    bn2_gamma=g2, bn2_beta=b2,
                                    compute_dtype=cdtype))
    out = jax.block_until_ready(fwd(x, adj))

    ref = _reference(x, adj, W, b, g1, b1, g2, b2)
    assert out.shape == (N0, N, F)
    tol = 3e-2 if use_bf16 else 1e-2
    assert jnp.allclose(out, ref, atol=tol, rtol=tol), "mismatch vs JAX reference"
    print("KERNEL_OK")
</pallas_src>

<mosaic_0001>
module attributes {stable_mosaic.version = 11 : i64} {
  func.func @_proj_kernel(%arg0: i32, %arg1: memref<32x64xf32, #tpu.memory_space<vmem>>, %arg2: memref<64x128xf32, #tpu.memory_space<vmem>>, %arg3: memref<64x128xf32, #tpu.memory_space<vmem>>, %arg4: memref<1x128xf32, #tpu.memory_space<vmem>>, %arg5: memref<32x128xf32, #tpu.memory_space<vmem>>, %arg6: memref<32x128xf32, #tpu.memory_space<vmem>>) attributes {dimension_semantics = [#tpu.dimension_semantics<parallel>], iteration_bounds = array<i64: 1>, scalar_prefetch = 0 : i64, scratch_operands = 0 : i64, tpu.core_type = #tpu.core_type<tc>, window_params = [{transform_indices = @transform_0, window_bounds = array<i64: 32, 64>}, {pipeline_mode = #tpu.pipeline_mode<synchronous>, transform_indices = @transform_1, window_bounds = array<i64: 64, 128>}, {pipeline_mode = #tpu.pipeline_mode<synchronous>, transform_indices = @transform_2, window_bounds = array<i64: 64, 128>}, {pipeline_mode = #tpu.pipeline_mode<synchronous>, transform_indices = @transform_3, window_bounds = array<i64: 1, 128>}, {transform_indices = @transform_4, window_bounds = array<i64: 32, 128>}, {transform_indices = @transform_5, window_bounds = array<i64: 32, 128>}]} {
    %c0 = arith.constant 0 : index
    %c0_0 = arith.constant 0 : index
    %0 = vector.load %arg1[%c0, %c0_0] : memref<32x64xf32, #tpu.memory_space<vmem>>, vector<32x64xf32>
    %c0_1 = arith.constant 0 : index
    %c0_2 = arith.constant 0 : index
    %1 = vector.load %arg2[%c0_1, %c0_2] : memref<64x128xf32, #tpu.memory_space<vmem>>, vector<64x128xf32>
    %cst = arith.constant dense<0.000000e+00> : vector<32x128xf32>
    %2 = tpu.matmul %0, %1, %cst {dimension_numbers = #tpu.dot_dimension_numbers<[1], [0], [0], [1], [0, 0, 1, 1], [], []>} : vector<32x64xf32>, vector<64x128xf32>, vector<32x128xf32> -> vector<32x128xf32>
    %c0_3 = arith.constant 0 : index
    %c0_4 = arith.constant 0 : index
    %3 = vector.load %arg4[%c0_3, %c0_4] : memref<1x128xf32, #tpu.memory_space<vmem>>, vector<1x128xf32>
    %4 = vector.broadcast %3 : vector<1x128xf32> to vector<32x128xf32>
    %5 = arith.addf %2, %4 : vector<32x128xf32>
    %c0_5 = arith.constant 0 : index
    %c0_6 = arith.constant 0 : index
    %6 = vector.load %arg5[%c0_5, %c0_6] : memref<32x128xf32, #tpu.memory_space<vmem>>, vector<32x128xf32>
    tpu.vector_store %arg5[%c0_5, %c0_6], %5 {strides = array<i32>} : memref<32x128xf32, #tpu.memory_space<vmem>>, vector<32x128xf32>,
    %c0_7 = arith.constant 0 : index
    %c0_8 = arith.constant 0 : index
    %7 = vector.load %arg3[%c0_7, %c0_8] : memref<64x128xf32, #tpu.memory_space<vmem>>, vector<64x128xf32>
    %cst_9 = arith.constant dense<0.000000e+00> : vector<32x128xf32>
    %8 = tpu.matmul %0, %7, %cst_9 {dimension_numbers = #tpu.dot_dimension_numbers<[1], [0], [0], [1], [0, 0, 1, 1], [], []>} : vector<32x64xf32>, vector<64x128xf32>, vector<32x128xf32> -> vector<32x128xf32>
    %c0_10 = arith.constant 0 : index
    %c0_11 = arith.constant 0 : index
    %9 = vector.load %arg6[%c0_10, %c0_11] : memref<32x128xf32, #tpu.memory_space<vmem>>, vector<32x128xf32>
    tpu.vector_store %arg6[%c0_10, %c0_11], %8 {strides = array<i32>} : memref<32x128xf32, #tpu.memory_space<vmem>>, vector<32x128xf32>,
    return
  }
  func.func @transform_0(%arg0: i32) -> (i32, i32) {
    %c0_i32 = arith.constant 0 : i32
    %c0_i32_0 = arith.constant 0 : i32
    return %arg0, %c0_i32 : i32, i32
  }
  func.func @transform_1(%arg0: i32) -> (i32, i32) {
    %c0_i32 = arith.constant 0 : i32
    %c0_i32_0 = arith.constant 0 : i32
    %c0_i32_1 = arith.constant 0 : i32
    return %c0_i32, %c0_i32_0 : i32, i32
  }
  func.func @transform_2(%arg0: i32) -> (i32, i32) {
    %c0_i32 = arith.constant 0 : i32
    %c0_i32_0 = arith.constant 0 : i32
    %c0_i32_1 = arith.constant 0 : i32
    return %c0_i32, %c0_i32_0 : i32, i32
  }
  func.func @transform_3(%arg0: i32) -> (i32, i32) {
    %c0_i32 = arith.constant 0 : i32
    %c0_i32_0 = arith.constant 0 : i32
    %c0_i32_1 = arith.constant 0 : i32
    return %c0_i32, %c0_i32_0 : i32, i32
  }
  func.func @transform_4(%arg0: i32) -> (i32, i32) {
    %c0_i32 = arith.constant 0 : i32
    %c0_i32_0 = arith.constant 0 : i32
    return %arg0, %c0_i32 : i32, i32
  }
  func.func @transform_5(%arg0: i32) -> (i32, i32) {
    %c0_i32 = arith.constant 0 : i32
    %c0_i32_0 = arith.constant 0 : i32
    return %arg0, %c0_i32 : i32, i32
  }
}

module attributes {stable_mosaic.version = 11 : i64} {
  func.func @_apply_kernel(%arg0: i32, %arg1: i32, %arg2: memref<1x16x128xf32, #tpu.memory_space<vmem>>, %arg3: memref<1x16x128xf32, #tpu.memory_space<vmem>>, %arg4: memref<1x16x16xf32, #tpu.memory_space<vmem>>, %arg5: memref<1x128xf32, #tpu.memory_space<vmem>>, %arg6: memref<1x16x64xf32, #tpu.memory_space<vmem>>) attributes {dimension_semantics = [#tpu.dimension_semantics<parallel>, #tpu.dimension_semantics<parallel>], iteration_bounds = array<i64: 2, 1>, scalar_prefetch = 0 : i64, scratch_operands = 0 : i64, tpu.core_type = #tpu.core_type<tc>, window_params = [{transform_indices = @transform_0, window_bounds = array<i64: 1, 16, 128>}, {transform_indices = @transform_1, window_bounds = array<i64: 1, 16, 128>}, {transform_indices = @transform_2, window_bounds = array<i64: 1, 16, 16>}, {pipeline_mode = #tpu.pipeline_mode<synchronous>, transform_indices = @transform_3, window_bounds = array<i64: 1, 128>}, {transform_indices = @transform_4, window_bounds = array<i64: 1, 16, 64>}]} {
    %c0 = arith.constant 0 : index
    %c0_0 = arith.constant 0 : index
    %c0_1 = arith.constant 0 : index
    %0 = vector.load %arg2[%c0, %c0_0, %c0_1] : memref<1x16x128xf32, #tpu.memory_space<vmem>>, vector<1x16x128xf32>
    %1 = vector.shape_cast %0 : vector<1x16x128xf32> to vector<16x128xf32>
    %c0_2 = arith.constant 0 : index
    %c0_3 = arith.constant 0 : index
    %c0_4 = arith.constant 0 : index
    %2 = vector.load %arg3[%c0_2, %c0_3, %c0_4] : memref<1x16x128xf32, #tpu.memory_space<vmem>>, vector<1x16x128xf32>
    %3 = vector.shape_cast %2 : vector<1x16x128xf32> to vector<16x128xf32>
    %c0_5 = arith.constant 0 : index
    %c0_6 = arith.constant 0 : index
    %c0_7 = arith.constant 0 : index
    %4 = vector.load %arg4[%c0_5, %c0_6, %c0_7] : memref<1x16x16xf32, #tpu.memory_space<vmem>>, vector<1x16x16xf32>
    %5 = vector.shape_cast %4 : vector<1x16x16xf32> to vector<16x16xf32>
    %c0_8 = arith.constant 0 : index
    %c0_9 = arith.constant 0 : index
    %6 = vector.load %arg5[%c0_8, %c0_9] : memref<1x128xf32, #tpu.memory_space<vmem>>, vector<1x128xf32>
    %7 = vector.shape_cast %6 : vector<1x128xf32> to vector<128xf32>
    %cst = arith.constant 1.000000e+00 : f32
    %8 = vector.broadcast %cst : f32 to vector<16x16xf32>
    %9 = arith.cmpf ogt, %5, %8 : vector<16x16xf32>
    %cst_10 = arith.constant 1.000000e+00 : f32
    %10 = vector.broadcast %cst_10 : f32 to vector<16x16xf32>
    %11 = arith.select %9, %10, %5 : vector<16x16xi1>, vector<16x16xf32>
    %12 = vector.shape_cast %1 : vector<16x128xf32> to vector<16x1x128xf32>
    %13 = vector.shape_cast %11 : vector<16x16xf32> to vector<16x16x1xf32>
    %14 = vector.shape_cast %3 : vector<16x128xf32> to vector<1x16x128xf32>
    %15 = vector.broadcast %13 : vector<16x16x1xf32> to vector<16x16x128xf32>
    %16 = vector.broadcast %14 : vector<1x16x128xf32> to vector<16x16x128xf32>
    %17 = arith.mulf %15, %16 : vector<16x16x128xf32>
    %18 = vector.broadcast %12 : vector<16x1x128xf32> to vector<16x16x128xf32>
    %19 = arith.addf %18, %17 : vector<16x16x128xf32>
    %20 = vector.shape_cast %5 : vector<16x16xf32> to vector<16x16x1xf32>
    %21 = vector.shape_cast %7 : vector<128xf32> to vector<1x1x128xf32>
    %22 = vector.broadcast %20 : vector<16x16x1xf32> to vector<16x16x128xf32>
    %23 = vector.broadcast %21 : vector<1x1x128xf32> to vector<16x16x128xf32>
    %24 = arith.mulf %22, %23 : vector<16x16x128xf32>
    %25 = arith.addf %19, %24 : vector<16x16x128xf32>
    %26 = math.absf %25 : vector<16x16x128xf32>
    %cst_11 = arith.constant 0.000000e+00 : f32
    %27 = vector.broadcast %cst_11 : f32 to vector<16x16x128xf32>
    %28 = arith.subf %27, %26 : vector<16x16x128xf32>
    %29 = math.exp %28 : vector<16x16x128xf32>
    %cst_12 = arith.constant 0.000000e+00 : f32
    %30 = vector.broadcast %cst_12 : f32 to vector<16x16x128xf32>
    %31 = arith.cmpf oge, %25, %30 : vector<16x16x128xf32>
    %cst_13 = arith.constant 1.000000e+00 : f32
    %32 = vector.broadcast %cst_13 : f32 to vector<16x16x128xf32>
    %33 = arith.select %31, %32, %29 : vector<16x16x128xi1>, vector<16x16x128xf32>
    %cst_14 = arith.constant 1.000000e+00 : f32
    %34 = vector.broadcast %cst_14 : f32 to vector<16x16x128xf32>
    %35 = arith.addf %34, %29 : vector<16x16x128xf32>
    %36 = arith.divf %33, %35 : vector<16x16x128xf32>
    %cst_15 = arith.constant 0.000000e+00 : f32
    %37 = vector.broadcast %cst_15 : f32 to vector<16x16x128xf32>
    %38 = arith.maximumf %25, %37 : vector<16x16x128xf32>
    %39 = math.log1p %29 : vector<16x16x128xf32>
    %40 = arith.addf %38, %39 : vector<16x16x128xf32>
    %c64_i32 = arith.constant 64 : i32
    %41 = tpu.dynamic_rotate %40 by %c64_i32 dim 2 : vector<16x16x128xf32>, i32 -> vector<16x16x128xf32>
    %42 = arith.mulf %36, %41 : vector<16x16x128xf32>
    %43 = vector.extract_strided_slice %42 {offsets = [0, 0, 0], sizes = [16, 16, 64], strides = [1, 1, 1]} : vector<16x16x128xf32> to vector<16x16x64xf32>
    %cst_16 = arith.constant dense<0.000000e+00> : vector<16x64xf32>
    %44 = vector.multi_reduction <add>, %43, %cst_16 [1] : vector<16x16x64xf32> to vector<16x64xf32>
    %45 = vector.shape_cast %44 : vector<16x64xf32> to vector<1x16x64xf32>
    %c0_17 = arith.constant 0 : index
    %c0_18 = arith.constant 0 : index
    %c0_19 = arith.constant 0 : index
    %46 = vector.load %arg6[%c0_17, %c0_18, %c0_19] : memref<1x16x64xf32, #tpu.memory_space<vmem>>, vector<1x16x64xf32>
    tpu.vector_store %arg6[%c0_17, %c0_18, %c0_19], %45 {strides = array<i32>} : memref<1x16x64xf32, #tpu.memory_space<vmem>>, vector<1x16x64xf32>,
    return
  }
  func.func @transform_0(%arg0: i32, %arg1: i32) -> (i32, i32, i32) {
    %c0_i32 = arith.constant 0 : i32
    %c0_i32_0 = arith.constant 0 : i32
    return %arg0, %arg1, %c0_i32 : i32, i32, i32
  }
  func.func @transform_1(%arg0: i32, %arg1: i32) -> (i32, i32, i32) {
    %c0_i32 = arith.constant 0 : i32
    %c0_i32_0 = arith.constant 0 : i32
    %c0_i32_1 = arith.constant 0 : i32
    return %arg0, %c0_i32, %c0_i32_0 : i32, i32, i32
  }
  func.func @transform_2(%arg0: i32, %arg1: i32) -> (i32, i32, i32) {
    %c0_i32 = arith.constant 0 : i32
    %c0_i32_0 = arith.constant 0 : i32
    return %arg0, %arg1, %c0_i32 : i32, i32, i32
  }
  func.func @transform_3(%arg0: i32, %arg1: i32) -> (i32, i32) {
    %c0_i32 = arith.constant 0 : i32
    %c0_i32_0 = arith.constant 0 : i32
    %c0_i32_1 = arith.constant 0 : i32
    return %c0_i32, %c0_i32_0 : i32, i32
  }
  func.func @transform_4(%arg0: i32, %arg1: i32) -> (i32, i32, i32) {
    %c0_i32 = arith.constant 0 : i32
    %c0_i32_0 = arith.constant 0 : i32
    return %arg0, %arg1, %c0_i32 : i32, i32, i32
  }
}

module attributes {stable_mosaic.version = 11 : i64} {
  func.func @_finalize_kernel(%arg0: i32, %arg1: memref<16x128xf32, #tpu.memory_space<vmem>>, %arg2: memref<16x128xf32, #tpu.memory_space<vmem>>, %arg3: memref<2x128xf32, #tpu.memory_space<vmem>>, %arg4: memref<16x128xf32, #tpu.memory_space<vmem>>) attributes {dimension_semantics = [#tpu.dimension_semantics<parallel>], iteration_bounds = array<i64: 1>, scalar_prefetch = 0 : i64, scratch_operands = 0 : i64, tpu.core_type = #tpu.core_type<tc>, window_params = [{transform_indices = @transform_0, window_bounds = array<i64: 16, 128>}, {transform_indices = @transform_1, window_bounds = array<i64: 16, 128>}, {pipeline_mode = #tpu.pipeline_mode<synchronous>, transform_indices = @transform_2, window_bounds = array<i64: 2, 128>}, {transform_indices = @transform_3, window_bounds = array<i64: 16, 128>}]} {
    %c0 = arith.constant 0 : index
    %c0_0 = arith.constant 0 : index
    %0 = vector.load %arg1[%c0, %c0_0] : memref<16x128xf32, #tpu.memory_space<vmem>>, vector<16x128xf32>
    %c0_1 = arith.constant 0 : index
    %c0_2 = arith.constant 0 : index
    %1 = vector.load %arg2[%c0_1, %c0_2] : memref<16x128xf32, #tpu.memory_space<vmem>>, vector<16x128xf32>
    %c0_3 = arith.constant 0 : index
    %c0_4 = arith.constant 0 : index
    %2 = vector.load %arg3[%c0_3, %c0_4] : memref<2x128xf32, #tpu.memory_space<vmem>>, vector<1x128xf32>
    %3 = vector.shape_cast %2 : vector<1x128xf32> to vector<128xf32>
    %4 = vector.shape_cast %3 : vector<128xf32> to vector<1x128xf32>
    %5 = vector.broadcast %4 : vector<1x128xf32> to vector<16x128xf32>
    %6 = arith.mulf %1, %5 : vector<16x128xf32>
    %7 = arith.addf %0, %6 : vector<16x128xf32>
    %c1 = arith.constant 1 : index
    %c0_5 = arith.constant 0 : index
    %8 = vector.load %arg3[%c1, %c0_5] : memref<2x128xf32, #tpu.memory_space<vmem>>, vector<1x128xf32>
    %9 = vector.shape_cast %8 : vector<1x128xf32> to vector<128xf32>
    %10 = vector.shape_cast %9 : vector<128xf32> to vector<1x128xf32>
    %11 = vector.broadcast %10 : vector<1x128xf32> to vector<16x128xf32>
    %12 = arith.addf %7, %11 : vector<16x128xf32>
    %cst = arith.constant 0.000000e+00 : f32
    %13 = vector.broadcast %cst : f32 to vector<16x128xf32>
    %14 = arith.maximumf %12, %13 : vector<16x128xf32>
    %15 = math.absf %12 : vector<16x128xf32>
    %cst_6 = arith.constant 0.000000e+00 : f32
    %16 = vector.broadcast %cst_6 : f32 to vector<16x128xf32>
    %17 = arith.subf %16, %15 : vector<16x128xf32>
    %18 = math.exp %17 : vector<16x128xf32>
    %19 = math.log1p %18 : vector<16x128xf32>
    %20 = arith.addf %14, %19 : vector<16x128xf32>
    %c0_7 = arith.constant 0 : index
    %c0_8 = arith.constant 0 : index
    %21 = vector.load %arg4[%c0_7, %c0_8] : memref<16x128xf32, #tpu.memory_space<vmem>>, vector<16x128xf32>
    tpu.vector_store %arg4[%c0_7, %c0_8], %20 {strides = array<i32>} : memref<16x128xf32, #tpu.memory_space<vmem>>, vector<16x128xf32>,
    return
  }
  func.func @transform_0(%arg0: i32) -> (i32, i32) {
    %c0_i32 = arith.constant 0 : i32
    %c0_i32_0 = arith.constant 0 : i32
    return %arg0, %c0_i32 : i32, i32
  }
  func.func @transform_1(%arg0: i32) -> (i32, i32) {
    %c0_i32 = arith.constant 0 : i32
    %c0_i32_0 = arith.constant 0 : i32
    return %arg0, %c0_i32 : i32, i32
  }
  func.func @transform_2(%arg0: i32) -> (i32, i32) {
    %c0_i32 = arith.constant 0 : i32
    %c0_i32_0 = arith.constant 0 : i32
    %c0_i32_1 = arith.constant 0 : i32
    return %c0_i32, %c0_i32_0 : i32, i32
  }
  func.func @transform_3(%arg0: i32) -> (i32, i32) {
    %c0_i32 = arith.constant 0 : i32
    %c0_i32_0 = arith.constant 0 : i32
    return %arg0, %c0_i32 : i32, i32
  }
}

</mosaic_0001>

<bundles_post_ra>
// kernel: tile.9
= control target key start
LH: loop header
LB: loop body
LE: loop exit
PB: predicated region body
PF: predicated region fallthrough
CT: control target
= control target key end

     0   :  { %s10_s10 = smov 3  ;;  %vm12_vm0 = vcmask 523264   ;;  %s29_s11 = smov 64   ;;  %vm19_vm1 = vcmask 1048064   ;;  %s49_s0 = inlined_call_operand.vmem [shape: f32[2,2,64], index: 0, kind: input, shape index: {}]   ;;  %s50_s1 = inlined_call_operand.vmem [shape: f32[2,128], index: 1, kind: output, shape index: {}]  }
   0x1   :  { %v27_v0 = vld [vmem:[%s49_s0 + $0x2] sm:$0x3]  ;;  %v8_v1 = vld [vmem:[%s49_s0] sm:$0x3]  ;;  %s15_s0 = smov 3 }
   0x2   :  { %7 = vst [vmem:[#allocation1 + $0x8] sm:$0x3] %v27_v0  ;;  %9 = vst [vmem:[#allocation1] sm:$0x3] %v8_v1 }
   0x9   :  { %v16_v2 = vld [vmem:[#allocation1 + $0x1] ss:$8 sm:%s15_s0]   ;;  %v11_v3 = vld [vmem:[#allocation1] ss:$8 sm:%s10_s10]  }
   0xa   :  { %17 = vrot.lane.b32.xlu0 %v16_v2, %s29_s11  ;;  %13 = vst.msk [vmem:[#allocation0] sm:$0x3] %vm12_vm0, %v11_v3  }
  0x7c   :  { %v18_v4 = vpop.permute.xlu0 %17  }
  0x7d   :  { %20 = vst.msk [vmem:[#allocation0] sm:$0x3] %vm19_vm1, %v18_v4  }
  0x84   :  { %v24_v5 = vld [vmem:[#allocation0] sm:$0x3] }
  0x85   :  { %26 = vst [vmem:[%s50_s1] sm:$0x3] %v24_v5 }

// kernel: conv_layer_forward.3
= control target key start
LH: loop header
LB: loop body
LE: loop exit
PB: predicated region body
PF: predicated region fallthrough
CT: control target
= control target key end

     0   :  { %11 = vsyncpa [#allocation3], 0  ;;  %s396_s18 = smov [#allocation2]   ;;  %s512_s0 = inlined_call_operand.vmem [shape: f32[32,64], index: 0, kind: input, shape index: {}]   ;;  %s513_s1 = inlined_call_operand.vmem [shape: f32[64,128], index: 1, kind: input, shape index: {}]   ;;  %s514_s2 = inlined_call_operand.hbm [shape: f32[64,128], index: 2, kind: input, shape index: {}]   ;;  %s515_s3 = inlined_call_operand.vmem [shape: f32[1,128], index: 3, kind: input, shape index: {}]   ;;  %s516_s4 = inlined_call_operand.vmem [shape: f32[32,128], index: 4, kind: output, shape index: {0}]   ;;  %s517_s5 = inlined_call_operand.vmem [shape: f32[32,128], index: 5, kind: output, shape index: {1}]  }
   0x1   :  { %s21_s19 = sshll.u32 %s396_s18, 4  ;;  %s372_s22 = scalar_lea.hbm %s514_s2, 1024  ;;  %s22_s19 = int_to_ptr.vmem [resolvable:$true] %s21_s19 }
   0x2   :  { %p373_p0 = scmp.ne.s32.totalorder %s514_s2, %s372_s22  ;;  %p376_p1 = scmp.lt.u32.totalorder %s372_s22, %s514_s2 }
   0x4   :  { %p378_p2 = pnand %p376_p1, %p373_p0 }
   0x6   :  { %381 = shalt.err (!%p378_p2)
}
   0x7   :  { %s382_s27 = scalar_lea.vmem %s22_s19, 1024  ;;  %p387_p4 = scmp.lt.s32.totalorder %s22_s19, %s22_s19 }
   0x8   :  { %p383_p3 = scmp.ne.s32.totalorder %s22_s19, %s382_s27  ;;  %p388_p5 = scmp.lt.s32.totalorder %s382_s27, %s382_s27 }
   0xa   :  { %p389_p6 = por %p388_p5, %p387_p4 }
   0xc   :  { %p390_p7 = pnand %p389_p6, %p383_p3 }
   0xe   :  { %393 = shalt.err (!%p390_p7)
}
   0xf   :  { %s397_s28 = smov 128   ;;  %s398_s29 = smov 8  }
  0x10   :  { %27 = dma.hbm_to_vmem [thread:$0]  %s514_s2, 1024, %s22_s19, [#allocation3], %s397_s28, %s397_s28, %s398_s29  }
  0x11   :  { %394 = dma.done.wait [#allocation3], 1024  }
  0x12   :  { %395 = vsyncadd [#allocation3], 4294966272  ;;  %v37_v0 = vld [vmem:[%s513_s1] sm:$0xff]  ;;  %v38_v1 = vld [vmem:[%s513_s1 + $0x8] sm:$0xff]  ;;  %vm52_vm0 = vcmask 523264  }
  0x13   :  { %v154_v2 = vld [vmem:[#allocation2] sm:$0xff]  ;;  %v337_v3 = vpack.c.bf16 %v38_v1, %v37_v0  ;;  %v155_v4 = vld [vmem:[#allocation2 + $0x8] sm:$0xff]  ;;  %v39_v5 = vld [vmem:[%s513_s1 + $0x10] sm:$0xff] }
  0x14   :  { %v40_v6 = vld [vmem:[%s513_s1 + $0x18] sm:$0xff]  ;;  %v353_v7 = vpack.c.bf16 %v155_v4, %v154_v2  ;;  %v156_v9 = vld [vmem:[#allocation2 + $0x10] sm:$0xff]  ;;  %v41_v11 = vld [vmem:[%s513_s1 + $0x20] sm:$0xff] }
  0x15   :  { %v341_v8 = vpack.c.bf16 %v40_v6, %v39_v5  ;;  %v157_v10 = vld [vmem:[#allocation2 + $0x18] sm:$0xff]  ;;  %338 = vmatprep.subr.bf16.mxu0 %v337_v3  ;;  %v42_v13 = vld [vmem:[%s513_s1 + $0x28] sm:$0xff]  ;;  %v158_v14 = vld [vmem:[#allocation2 + $0x20] sm:$0xff] }
  0x16   :  { %v357_v12 = vpack.c.bf16 %v157_v10, %v156_v9  ;;  %v159_v15 = vld [vmem:[#allocation2 + $0x28] sm:$0xff]  ;;  %340 = vmatpush3.bf16.msra.mxu0 %v337_v3  ;;  %354 = vmatprep.subr.bf16.mxu1 %v353_v7  ;;  %v345_v16 = vpack.c.bf16 %v42_v13, %v41_v11  ;;  %v33_v17 = vld [vmem:[%s512_s0] sm:$0xff]  ;;  %v43_v19 = vld [vmem:[%s513_s1 + $0x30] sm:$0xff] }
  0x17   :  { %356 = vmatpush3.bf16.msra.mxu1 %v353_v7  ;;  %342 = vmatprep.subr.bf16.mxu0 %v341_v8  ;;  %v361_v18 = vpack.c.bf16 %v159_v15, %v158_v14  ;;  %v44_v20 = vld [vmem:[%s513_s1 + $0x38] sm:$0xff]  ;;  %v160_v21 = vld [vmem:[#allocation2 + $0x30] sm:$0xff]  ;;  %v34_v25 = vld [vmem:[%s512_s0 + $0x8] sm:$0xff] }
  0x18   :  { %358 = vmatprep.subr.bf16.mxu1 %v357_v12  ;;  %309 = vmatprep.mubr.msk.f32.mxu0 %vm52_vm0, %v33_v17  ;;  %v161_v22 = vld [vmem:[#allocation2 + $0x38] sm:$0xff]  ;;  %v349_v23 = vpack.c.bf16 %v44_v20, %v43_v19  ;;  %v35_v26 = vld [vmem:[%s512_s0 + $0x10] sm:$0xff]  ;;  %v260_v28 = vld [vmem:[%s515_s3] ss:$0 sm:$0xff] }
  0x19   :  { %331 = vmatprep.mubr.msk.f32.mxu1 %vm52_vm0, %v33_v17  ;;  %v365_v24 = vpack.c.bf16 %v161_v22, %v160_v21  ;;  %v36_v27 = vld [vmem:[%s512_s0 + $0x18] sm:$0xff] }
  0x1a   :  { %344 = vmatpush3.bf16.msra.mxu0 %v341_v8 }
  0x1b   :  { %360 = vmatpush3.bf16.msra.mxu1 %v357_v12  ;;  %346 = vmatprep.subr.bf16.mxu0 %v345_v16 }
  0x1c   :  { %362 = vmatprep.subr.bf16.mxu1 %v361_v18 }
  0x1e   :  { %348 = vmatpush3.bf16.msra.mxu0 %v345_v16 }
  0x1f   :  { %364 = vmatpush3.bf16.msra.mxu1 %v361_v18  ;;  %350 = vmatprep.subr.bf16.mxu0 %v349_v23 }
  0x20   :  { %366 = vmatprep.subr.bf16.mxu1 %v365_v24 }
  0x22   :  { %352 = vmatpush3.bf16.msra.mxu0 %v349_v23 }
  0x23   :  { %368 = vmatpush3.bf16.msra.mxu1 %v365_v24 }
  0x25   :  { %310 = vmatmul.mubr.msk.f32.vlgmr.msra.gmra.mrb[0].mxu0 %vm52_vm0, %v34_v25 }
  0x26   :  { %332 = vmatmul.mubr.msk.f32.vlgmr.msra.gmra.mrb[0].mxu1 %vm52_vm0, %v34_v25  ;;  %312 = vmatprep.mubr.msk.f32.mxu0 %vm52_vm0, %v35_v26 }
  0x27   :  { %334 = vmatprep.mubr.msk.f32.mxu1 %vm52_vm0, %v35_v26 }
  0x29   :  { %313 = vmatmul.mubr.msk.f32.gmra.mrb[2].mxu0 %vm52_vm0, %v36_v27 }
  0x2a   :  { %335 = vmatmul.mubr.msk.f32.gmra.mrb[2].mxu1 %vm52_vm0, %v36_v27 }
  0xf8   :  { %v311_v29 = vpop.f32.mrb[0].mxu0 }
  0xf9   :  { %v137_v30 = vadd.f32 %v311_v29, %v260_v28  ;;  %v131_v31 = vpop.f32.mrb[1].mxu0  ;;  %v333_v32 = vpop.f32.mrb[0].mxu1 }
  0xfa   :  { %v132_v33 = vadd.f32 %v260_v28, %v131_v31  ;;  %248 = vst [vmem:[%s517_s5 + $0x8] sm:$0xff] %v333_v32  ;;  %v228_v34 = vpop.f32.mrb[1].mxu1 }
  0xfb   :  { %151 = vst [vmem:[%s516_s4 + $0x8] sm:$0xff] %v137_v30  ;;  %247 = vst [vmem:[%s517_s5] sm:$0xff] %v228_v34 }
  0xfc   :  { %150 = vst [vmem:[%s516_s4] sm:$0xff] %v132_v33  ;;  %v314_v35 = vpop.f32.mrb[2].mxu0 }
  0xfd   :  { %v147_v36 = vadd.f32 %v314_v35, %v260_v28  ;;  %v141_v37 = vpop.f32.mrb[3].mxu0  ;;  %v336_v38 = vpop.f32.mrb[2].mxu1 }
  0xfe   :  { %v142_v39 = vadd.f32 %v260_v28, %v141_v37  ;;  %250 = vst [vmem:[%s517_s5 + $0x18] sm:$0xff] %v336_v38  ;;  %v238_v40 = vpop.f32.mrb[3].mxu1 }
  0xff   :  { %153 = vst [vmem:[%s516_s4 + $0x18] sm:$0xff] %v147_v36  ;;  %249 = vst [vmem:[%s517_s5 + $0x10] sm:$0xff] %v238_v40 }
 0x100   :  { %152 = vst [vmem:[%s516_s4 + $0x10] sm:$0xff] %v142_v39 }
 0x101   :  { %259 = vsyncpa [#allocation3], 1 }

// kernel: conv_layer_forward.5
= control target key start
LH: loop header
LB: loop body
LE: loop exit
PB: predicated region body
PF: predicated region fallthrough
CT: control target
= control target key end

     0   :  { %s124_s0 = inlined_call_operand.vmem [shape: f32[16,128], index: 0, kind: input, shape index: {}]   ;;  %s125_s1 = inlined_call_operand.vmem [shape: f32[16,128], index: 1, kind: input, shape index: {}]   ;;  %s126_s2 = inlined_call_operand.vmem [shape: f32[2,128], index: 2, kind: input, shape index: {}]   ;;  %s127_s3 = inlined_call_operand.vmem [shape: f32[16,128], index: 3, kind: output, shape index: {}]  }
   0x1   :  { %v14_v0 = vld [vmem:[%s124_s0] sm:$0xff]  ;;  %v15_v4 = vld [vmem:[%s124_s0 + $0x8] sm:$0xff] }
   0x2   :  { %v16_v1 = vld [vmem:[%s125_s1] sm:$0xff]  ;;  %v17_v5 = vld [vmem:[%s125_s1 + $0x8] sm:$0xff] }
   0x3   :  { %v70_v2 = vld [vmem:[%s126_s2] ss:$0 sm:$0xff]  ;;  %v71_v6 = vld [vmem:[%s126_s2 + $0x1] ss:$0 sm:$0xff] }
   0x4   :  { %v23_v3 = vmul.f32 %v70_v2, %v16_v1  ;;  %v24_v7 = vmul.f32 %v70_v2, %v17_v5 }
   0x6   :  { %v25_v8 = vadd.f32 %v23_v3, %v14_v0  ;;  %v26_v9 = vadd.f32 %v24_v7, %v15_v4 }
   0x8   :  { %v32_v10 = vadd.f32 %v71_v6, %v25_v8  ;;  %v33_v11 = vadd.f32 %v71_v6, %v26_v9 }
   0xa   :  { %v36_v12 = vand.u32 2147483647, %v32_v10  ;;  %v37_v13 = vand.u32 2147483647, %v33_v11  ;;  %v34_v30 = vmax.f32 %v32_v10, 0.0  ;;  %v35_v34 = vmax.f32 %v33_v11, 0.0 }
   0xc   :  { %v38_v14 = vsub.f32 0.0, %v36_v12  ;;  %v39_v15 = vsub.f32 0.0, %v37_v13 }
   0xe   :  { %v40_v16 = vmul.f32 1.442695, %v38_v14  ;;  %v42_v17 = vmul.f32 1.442695, %v39_v15 }
  0x10   :  { %72 = vpow2.f32 %v40_v16 }
  0x11   :  { %74 = vpow2.f32 %v42_v17 }
  0x1a   :  { %v73_v18 = vpop.eup %72 }
  0x1b   :  { %v75_v19 = vpop.eup %74  ;;  %v44_v20 = vadd.f32 1.0, %v73_v18  ;;  %v47_v22 = vmul.f32 -0.5, %v73_v18  ;;  %v50_v25 = vand.u32 2147483647, %v73_v18 }
  0x1c   :  { %v53_v21 = vadd.f32 1.0, %v75_v19  ;;  %v56_v23 = vmul.f32 -0.5, %v75_v19  ;;  %v59_v27 = vand.u32 2147483647, %v75_v19 }
  0x1d   :  { %76 = vlog2.f32 %v44_v20  ;;  %v48_v24 = vadd.f32 1.0, %v47_v22  ;;  %vm51_vm0 = vcmp.lt.f32.partialorder %v50_v25, 0.0004427343 }
  0x1e   :  { %78 = vlog2.f32 %v53_v21  ;;  %v57_v26 = vadd.f32 1.0, %v56_v23  ;;  %vm60_vm1 = vcmp.lt.f32.partialorder %v59_v27, 0.0004427343 }
  0x1f   :  { %v49_v28 = vmul.f32 %v73_v18, %v48_v24 }
  0x20   :  { %v58_v31 = vmul.f32 %v75_v19, %v57_v26 }
  0x27   :  { %v77_v29 = vpop.eup %76 }
  0x28   :  { %v79_v32 = vpop.eup %78  ;;  %v46_v33 = vmul.f32 0.6931472, %v77_v29 }
  0x29   :  { %v55_v35 = vmul.f32 0.6931472, %v79_v32 }
  0x2a   :  { %v52_v36 = vsel %vm51_vm0, %v49_v28, %v46_v33 }
  0x2b   :  { %v62_v37 = vadd.f32 %v52_v36, %v34_v30  ;;  %v61_v38 = vsel %vm60_vm1, %v58_v31, %v55_v35 }
  0x2c   :  { %v63_v39 = vadd.f32 %v61_v38, %v35_v34 }
  0x2d   :  { %64 = vst [vmem:[%s127_s3] sm:$0xff] %v62_v37 }
  0x2e   :  { %65 = vst [vmem:[%s127_s3 + $0x8] sm:$0xff] %v63_v39 }

// kernel: conv_layer_forward.4
= control target key start
LH: loop header
LB: loop body
LE: loop exit
PB: predicated region body
PF: predicated region fallthrough
CT: control target
= control target key end

     0   :  { %s2300_s15 = smov 0   ;;  %s2302_s16 = smov 0   ;;  %s3489_s0 = inlined_call_operand.vmem [shape: f32[2,16,128], index: 0, kind: input, shape index: {}]   ;;  %s3490_s1 = inlined_call_operand.vmem [shape: f32[2,16,128], index: 1, kind: input, shape index: {}]   ;;  %s3491_s2 = inlined_call_operand.vmem [shape: f32[2,16,16], index: 2, kind: input, shape index: {}]   ;;  %s3492_s3 = inlined_call_operand.vmem [shape: f32[1,128], index: 3, kind: input, shape index: {}]   ;;  %s3493_s4 = inlined_call_operand.vmem [shape: f32[2,16,64], index: 4, kind: output, shape index: {}]  }
   0x1   :  { %s2304_s17 = smov 0  }
   0x2 LB: > { %s26_s18 = sadd.s32 1, %s2267_s16  ;;  %p2013_p0 = scmp.ge.s32.totalorder %s2271_s17, 1  ;;  %s2271_s17 = sphi %s2304_s17, %s14_s17   ;;  %s2267_s16 = sphi %s2302_s16, %s3696_s16   ;;  %s2263_s15 = sphi %s2300_s15, %s3695_s15  }
   0x3   : > { %p28_p1 = scmp.ge.s32.totalorder %s26_s18, 2  ;;  %p210_p2 = scmp.lt.s32.totalorder %s2271_s17, 3 }
   0x5   : > { %s3698_s18 = smov (%p28_p1, %s26_s18), 0  ;;  %p211_p3 = pnand %p2013_p0, %p210_p2 }
   0x7   : > { %214 = sbr.rel (%p211_p3) target bundleno = 466 (0x1d2), region = 36 }
   0xe   : > { %p259_p4 = scmp.lt.s32.totalorder %s2263_s15, 1  ;;  %v310_v0 = vlaneseq  ;;  %v2273_v31 = vmov 1966171168   ;;  %s2274_s5 = smov 64  }
   0xf   : > { %v308_v32 = vunpack.c.l.s4 %v2273_v31 }
  0x10   : > { %s3700_s15 = smov (!%p259_p4, %s2263_s15), 1  ;;  %v2318_v1 = vshrl.u32 %v310_v0, 7 }
  0x11   : > { %s2320_s19 = sshll.u32 %s3700_s15, 4  ;;  %v309_v34 = vunpack.c.0.s8 %v308_v32 }
  0x12   : > { %s281_s22 = scalar_lea.vmem %s3491_s2, %s2320_s19  ;;  %v2327_v2 = vsub.s32 0, %v2318_v1  ;;  %v2330_v3 = vsub.s32 1, %v2318_v1  ;;  %v2341_v7 = vsub.s32 5, %v2318_v1  ;;  %v472_v10 = vsub.s32 6, %v2318_v1  ;;  %s266_s25 = scalar_lea.vmem %s3489_s0, %s2320_s19 }
  0x13   : > { %v2332_v4 = vld [vmem:[%s281_s22] sm:$0xff]  ;;  %v2335_v5 = vld [vmem:[%s281_s22 + $0x8] sm:$0xff]  ;;  %v483_v11 = vsub.s32 7, %v2318_v1  ;;  %v2351_v12 = vsub.s32 2, %v2318_v1  ;;  %v439_v29 = vsub.s32 3, %v2318_v1  ;;  %v2412_v37 = vsub.s32 %v309_v34, %v2318_v1  ;;  %s272_s28 = scalar_lea.vmem %s3490_s1, %s2320_s19  ;;  %s291_s8 = scalar_lea.vmem %s3493_s4, %s2320_s19 }
  0x14   : > { %vm300_vm0 = vcmp.gt.f32.partialorder %v2332_v4, 1.0  ;;  %vm301_vm1 = vcmp.gt.f32.partialorder %v2335_v5, 1.0  ;;  %v2374_v19 = vrot.slane %v2332_v4, %v2341_v7  ;;  %v2380_v21 = vrot.slane %v2335_v5, %v2341_v7  ;;  %v2409_v36 = vld [vmem:[%s266_s25] sm:$0xff]  ;;  %v2419_v41 = vld [vmem:[%s266_s25 + $0x8] sm:$0xff] }
  0x15   : > { %v2338_v6 = vsel %vm300_vm0, 1.0, %v2332_v4  ;;  %v2354_v13 = vsel %vm301_vm1, 1.0, %v2335_v5  ;;  %v2383_v22 = vrot.slane %v2332_v4, %v472_v10  ;;  %v2386_v23 = vrot.slane %v2335_v5, %v472_v10 }
  0x16   : > { %v418_v8 = vrot.slane %v2338_v6, %v2330_v3  ;;  %v407_v9 = vrot.slane %v2338_v6, %v2327_v2  ;;  %v2358_v14 = vrot.slane %v2338_v6, %v2341_v7  ;;  %v2361_v15 = vrot.slane %v2338_v6, %v472_v10 }
  0x17   : > { %v2364_v16 = vrot.slane %v2354_v13, %v472_v10  ;;  %v2367_v17 = vrot.slane %v2338_v6, %v483_v11  ;;  %v2370_v18 = vrot.slane %v2354_v13, %v483_v11  ;;  %v429_v20 = vrot.slane %v2338_v6, %v2351_v12 }
  0x18   : > { %420 = vbcast.lane.b32.xlu1 %v418_v8, 256  ;;  %409 = vbcast.lane.b32.xlu0 %v407_v9, 256  ;;  %v2389_v24 = vrot.slane %v2332_v4, %v483_v11  ;;  %v2392_v25 = vrot.slane %v2335_v5, %v483_v11  ;;  %v495_v26 = vrot.slane %v2354_v13, %v2327_v2  ;;  %v450_v48 = vsub.s32 4, %v2318_v1 }
  0x19   : > { %v506_v27 = vrot.slane %v2354_v13, %v2330_v3  ;;  %v517_v28 = vrot.slane %v2354_v13, %v2351_v12  ;;  %v440_v30 = vrot.slane %v2338_v6, %v439_v29  ;;  %v528_v33 = vrot.slane %v2354_v13, %v439_v29 }
  0x1a   : > { %v727_v35 = vrot.slane %v2332_v4, %v2327_v2  ;;  %v306_v38 = vcombine.high %v2409_v36, %v2409_v36  ;;  %v738_v39 = vrot.slane %v2332_v4, %v2330_v3  ;;  %v355_v43 = vcombine.high %v2419_v41, %v2419_v41 }
  0x1b   : > { %v815_v44 = vrot.slane %v2335_v5, %v2327_v2  ;;  %v826_v47 = vrot.slane %v2335_v5, %v2330_v3  ;;  %v451_v49 = vrot.slane %v2338_v6, %v450_v48  ;;  %v539_v50 = vrot.slane %v2354_v13, %v450_v48 }
  0x1c   : > { %424 = vbcast.lane.b32.xlu1 %v418_v8, 264  ;;  %413 = vbcast.lane.b32.xlu0 %v407_v9, 264  ;;  %v320_v40 = vrot.slane %v306_v38, %v2412_v37  ;;  %v369_v45 = vrot.slane %v355_v43, %v2412_v37  ;;  %v749_v53 = vrot.slane %v2332_v4, %v2351_v12 }
  0x1d   : > { %v837_v56 = vrot.slane %v2335_v5, %v2351_v12  ;;  %v550_v57 = vrot.slane %v2354_v13, %v2341_v7  ;;  %v760_v58 = vrot.slane %v2332_v4, %v439_v29  ;;  %v848_v59 = vrot.slane %v2335_v5, %v439_v29 }
  0x1e   : > { %v2422_v42 = vrot.slane %v320_v40, %v2412_v37  ;;  %v2430_v46 = vrot.slane %v369_v45, %v2412_v37  ;;  %v322_v51 = vcombine.high %v320_v40, %v320_v40  ;;  %v371_v54 = vcombine.high %v369_v45, %v369_v45 }
  0x1f   : > { %v771_v60 = vrot.slane %v2332_v4, %v450_v48  ;;  %v859_v61 = vrot.slane %v2335_v5, %v450_v48  ;;  %v313_v5 = vrot.slane %v2409_v36, %v2412_v37  ;;  %v362_v9 = vrot.slane %v2419_v41, %v2412_v37 }
  0x20   : > { %435 = vbcast.lane.b32.xlu1 %v429_v20, 264  ;;  %431 = vbcast.lane.b32.xlu0 %v429_v20, 256  ;;  %v2438_v52 = vrot.slane %v322_v51, %v2412_v37  ;;  %v2443_v55 = vrot.slane %v371_v54, %v2412_v37  ;;  %v2502_v20 = vld [vmem:[%s272_s28] sm:$0xff] }
  0x21   : > { %v321_v8 = vcombine.high %v313_v5, %v313_v5  ;;  %v370_v13 = vcombine.high %v362_v9, %v362_v9 }
  0x23   : > { %v343_v12 = vrot.slane %v321_v8, %v2412_v37 }
  0x24   : > { %501 = vbcast.lane.b32.xlu1 %v495_v26, 264  ;;  %497 = vbcast.lane.b32.xlu0 %v495_v26, 256  ;;  %v378_v26 = vrot.slane %v362_v9, %v2412_v37 }
  0x26   : > { %v400_v38 = vcombine.high %v378_v26, %v378_v26  ;;  %v647_v40 = vrot.slane %v378_v26, %v2327_v2 }
  0x28   : > { %512 = vbcast.lane.b32.xlu1 %v506_v27, 264  ;;  %508 = vbcast.lane.b32.xlu0 %v506_v27, 256 }
  0x2c   : > { %523 = vbcast.lane.b32.xlu1 %v517_v28, 264  ;;  %519 = vbcast.lane.b32.xlu0 %v517_v28, 256 }
  0x30   : > { %446 = vbcast.lane.b32.xlu1 %v440_v30, 264  ;;  %442 = vbcast.lane.b32.xlu0 %v440_v30, 256 }
  0x34   : > { %534 = vbcast.lane.b32.xlu1 %v528_v33, 264  ;;  %530 = vbcast.lane.b32.xlu0 %v528_v33, 256 }
  0x38   : > { %733 = vbcast.lane.b32.xlu1 %v727_v35, 264  ;;  %729 = vbcast.lane.b32.xlu0 %v727_v35, 256 }
  0x3c   : > { %744 = vbcast.lane.b32.xlu1 %v738_v39, 264  ;;  %740 = vbcast.lane.b32.xlu0 %v738_v39, 256  ;;  %v619_v39 = vrot.slane %v343_v12, %v2327_v2 }
  0x40   : > { %821 = vbcast.lane.b32.xlu1 %v815_v44, 264  ;;  %817 = vbcast.lane.b32.xlu0 %v815_v44, 256 }
  0x44   : > { %832 = vbcast.lane.b32.xlu1 %v826_v47, 264  ;;  %828 = vbcast.lane.b32.xlu0 %v826_v47, 256 }
  0x48   : > { %457 = vbcast.lane.b32.xlu1 %v451_v49, 264  ;;  %453 = vbcast.lane.b32.xlu0 %v451_v49, 256 }
  0x4c   : > { %545 = vbcast.lane.b32.xlu1 %v539_v50, 264  ;;  %541 = vbcast.lane.b32.xlu0 %v539_v50, 256 }
  0x50   : > { %755 = vbcast.lane.b32.xlu1 %v749_v53, 264  ;;  %751 = vbcast.lane.b32.xlu0 %v749_v53, 256 }
  0x54   : > { %843 = vbcast.lane.b32.xlu1 %v837_v56, 264  ;;  %839 = vbcast.lane.b32.xlu0 %v837_v56, 256 }
  0x58   : > { %468 = vbcast.lane.b32.xlu1 %v2358_v14, 264  ;;  %464 = vbcast.lane.b32.xlu0 %v2358_v14, 256  ;;  %v353_v14 = vcombine.high %v343_v12, %v343_v12 }
  0x5c   : > { %556 = vbcast.lane.b32.xlu1 %v550_v57, 264  ;;  %552 = vbcast.lane.b32.xlu0 %v550_v57, 256  ;;  %v2540_v57 = vrot.slane %v400_v38, %v2327_v2 }
  0x60   : > { %766 = vbcast.lane.b32.xlu1 %v760_v58, 264  ;;  %762 = vbcast.lane.b32.xlu0 %v760_v58, 256  ;;  %v2544_v58 = vrot.slane %v2422_v42, %v2327_v2 }
  0x64   : > { %854 = vbcast.lane.b32.xlu1 %v848_v59, 264  ;;  %850 = vbcast.lane.b32.xlu0 %v848_v59, 256  ;;  %v2548_v59 = vrot.slane %v2430_v46, %v2327_v2 }
  0x68   : > { %479 = vbcast.lane.b32.xlu1 %v2361_v15, 264  ;;  %475 = vbcast.lane.b32.xlu0 %v2361_v15, 256 }
  0x6c   : > { %567 = vbcast.lane.b32.xlu1 %v2364_v16, 264  ;;  %563 = vbcast.lane.b32.xlu0 %v2364_v16, 256 }
  0x70   : > { %777 = vbcast.lane.b32.xlu1 %v771_v60, 264  ;;  %773 = vbcast.lane.b32.xlu0 %v771_v60, 256  ;;  %v2552_v60 = vrot.slane %v2438_v52, %v2327_v2 }
  0x74   : > { %865 = vbcast.lane.b32.xlu1 %v859_v61, 264  ;;  %861 = vbcast.lane.b32.xlu0 %v859_v61, 256 }
  0x78   : > { %490 = vbcast.lane.b32.xlu1 %v2367_v17, 264  ;;  %486 = vbcast.lane.b32.xlu0 %v2367_v17, 256  ;;  %v392_v17 = vrot.slane %v370_v13, %v2412_v37  ;;  %v401_v13 = vcombine.high %v2430_v46, %v2430_v46  ;;  %v354_v46 = vcombine.high %v2438_v52, %v2438_v52 }
  0x7a   : > { %v651_v48 = vrot.slane %v392_v17, %v2327_v2 }
  0x7c   : > { %578 = vbcast.lane.b32.xlu1 %v2370_v18, 264  ;;  %574 = vbcast.lane.b32.xlu0 %v2370_v18, 256  ;;  %v2500_v18 = vrot.slane %v353_v14, %v2327_v2 }
  0x80   : > { %788 = vbcast.lane.b32.xlu1 %v2374_v19, 264  ;;  %784 = vbcast.lane.b32.xlu0 %v2374_v19, 256  ;;  %v402_v19 = vcombine.high %v392_v17, %v392_v17 }
  0x82   : > { %v659_v28 = vrot.slane %v402_v19, %v2327_v2 }
  0x84   : > { %876 = vbcast.lane.b32.xlu1 %v2380_v21, 264  ;;  %872 = vbcast.lane.b32.xlu0 %v2380_v21, 256  ;;  %v329_v21 = vrot.slane %v313_v5, %v2412_v37  ;;  %v2523_v37 = vld [vmem:[%s3492_s3] ss:$0 sm:$0xff] }
  0x86   : > { %v615_v29 = vrot.slane %v329_v21, %v2327_v2  ;;  %v351_v30 = vcombine.high %v329_v21, %v329_v21 }
  0x88   : > { %799 = vbcast.lane.b32.xlu1 %v2383_v22, 264  ;;  %795 = vbcast.lane.b32.xlu0 %v2383_v22, 256  ;;  %v2534_v47 = vrot.slane %v351_v30, %v2327_v2 }
  0x8a   : > { %v421_v62 = vpop.permute.xlu1 %420  ;;  %v410_v63 = vpop.permute.xlu0 %409 }
  0x8b   : > { %v580_v33 = vmul.f32 %v410_v63, %v2502_v20  ;;  %v582_v44 = vmul.f32 %v421_v62, %v2502_v20  ;;  %v2560_v63 = vrot.slane %v2443_v55, %v2327_v2 }
  0x8c   : > { %887 = vbcast.lane.b32.xlu1 %v2386_v23, 264  ;;  %883 = vbcast.lane.b32.xlu0 %v2386_v23, 256 }
  0x8d   : > { %v692_v51 = vadd.f32 %v615_v29, %v580_v33 }
  0x8e   : > { %v425_v0 = vpop.permute.xlu1 %424  ;;  %v414_v1 = vpop.permute.xlu0 %413 }
  0x90   : > { %810 = vbcast.lane.b32.xlu1 %v2389_v24, 264  ;;  %806 = vbcast.lane.b32.xlu0 %v2389_v24, 256 }
  0x92   : > { %v2473_v3 = vpop.permute.xlu1 %435  ;;  %v2475_v4 = vpop.permute.xlu0 %431 }
  0x94   : > { %898 = vbcast.lane.b32.xlu1 %v2392_v25, 264  ;;  %894 = vbcast.lane.b32.xlu0 %v2392_v25, 256  ;;  %v2508_v25 = vld [vmem:[%s272_s28 + $0x8] sm:$0xff] }
  0x95   : > { %v581_v34 = vmul.f32 %v414_v1, %v2508_v25  ;;  %v583_v45 = vmul.f32 %v425_v0, %v2508_v25  ;;  %v352_v0 = vcombine.high %v2422_v42, %v2422_v42  ;;  %v694_v1 = vadd.f32 %v619_v39, %v582_v44 }
  0x96   : > { %v502_v6 = vpop.permute.xlu1 %501  ;;  %v2481_v7 = vpop.permute.xlu0 %497  ;;  %v585_v30 = vmul.f32 %v2473_v3, %v2508_v25 }
  0x97   : > { %v693_v53 = vadd.f32 %v615_v29, %v581_v34  ;;  %v695_v5 = vadd.f32 %v619_v39, %v583_v45  ;;  %v597_v8 = vmul.f32 %v502_v6, %v2508_v25  ;;  %v596_v42 = vmul.f32 %v2481_v7, %v2502_v20 }
  0x98   : > { %v584_v7 = vmul.f32 %v2475_v4, %v2502_v20 }
  0x9a   : > { %v2485_v10 = vpop.permute.xlu1 %512  ;;  %v2487_v11 = vpop.permute.xlu0 %508 }
  0x9b   : > { %v598_v6 = vmul.f32 %v2487_v11, %v2502_v20  ;;  %v403_v11 = vcombine.high %v2443_v55, %v2443_v55 }
  0x9d   : > { %v710_v44 = vadd.f32 %v651_v48, %v598_v6 }
  0x9e   : > { %v2490_v15 = vpop.permute.xlu1 %523  ;;  %v2492_v16 = vpop.permute.xlu0 %519 }
  0x9f   : > { %v601_v55 = vmul.f32 %v2490_v15, %v2508_v25 }
  0xa2   : > { %v2505_v22 = vpop.permute.xlu1 %446  ;;  %v443_v23 = vpop.permute.xlu0 %442 }
  0xa3   : > { %v586_v24 = vmul.f32 %v443_v23, %v2502_v20  ;;  %v599_v23 = vmul.f32 %v2485_v10, %v2508_v25 }
  0xa5   : > { %v2512_v27 = vadd.f32 %v2500_v18, %v586_v24  ;;  %v711_v38 = vadd.f32 %v651_v48, %v599_v23 }
  0xa6   : > { %v535_v31 = vpop.permute.xlu1 %534  ;;  %v531_v32 = vpop.permute.xlu0 %530 }
  0xa7   : > { %v603_v35 = vmul.f32 %v535_v31, %v2508_v25  ;;  %v602_v36 = vmul.f32 %v531_v32, %v2502_v20  ;;  %v709_v31 = vadd.f32 %v647_v40, %v597_v8 }
  0xa9   : > { %v2527_v41 = vadd.f32 %v659_v28, %v603_v35  ;;  %v2529_v43 = vadd.f32 %v659_v28, %v602_v36  ;;  %v708_v36 = vadd.f32 %v647_v40, %v596_v42  ;;  %v2612_v42 = vrot.slane %v352_v0, %v2327_v2 }
  0xaa   : > { %v734_v49 = vpop.permute.xlu1 %733  ;;  %v730_v50 = vpop.permute.xlu0 %729  ;;  %v2628_v0 = vrot.slane %v403_v11, %v2327_v2 }
  0xab   : > { %v907_v54 = vmul.f32 %v2523_v37, %v734_v49  ;;  %v906_v56 = vmul.f32 %v2523_v37, %v730_v50 }
  0xad   : > { %v2554_v61 = vadd.f32 %v907_v54, %v693_v53  ;;  %v2556_v62 = vadd.f32 %v906_v56, %v692_v51 }
  0xae   : > { %v745_v9 = vpop.permute.xlu1 %744  ;;  %v741_v12 = vpop.permute.xlu0 %740 }
  0xaf   : > { %v971_v14 = vand.u32 2147483647, %v2554_v61  ;;  %v970_v17 = vand.u32 2147483647, %v2556_v62  ;;  %v909_v19 = vmul.f32 %v2523_v37, %v745_v9  ;;  %v908_v21 = vmul.f32 %v2523_v37, %v741_v12 }
  0xb0   : > { %vm1099_vm2 = vcmp.ge.f32.partialorder %v2554_v61, 0.0 }
  0xb1   : > { %v1003_v24 = vsub.f32 0.0, %v971_v14  ;;  %v1002_v26 = vsub.f32 0.0, %v970_v17  ;;  %v2579_v28 = vadd.f32 %v909_v19, %v695_v5  ;;  %v2581_v29 = vadd.f32 %v908_v21, %v694_v1 }
  0xb2   : > { %v822_v10 = vpop.permute.xlu1 %821  ;;  %v818_v32 = vpop.permute.xlu0 %817  ;;  %v600_v1 = vmul.f32 %v2492_v16, %v2502_v20  ;;  %v587_v5 = vmul.f32 %v2505_v22, %v2508_v25  ;;  %v2615_v16 = vrot.slane %v401_v13, %v2327_v2 }
  0xb3   : > { %v1036_v33 = vmul.f32 1.442695, %v1003_v24  ;;  %v1034_v52 = vmul.f32 1.442695, %v1002_v26  ;;  %v973_v34 = vand.u32 2147483647, %v2579_v28  ;;  %v923_v35 = vmul.f32 %v2523_v37, %v822_v10 }
  0xb4   : > { %v972_v39 = vand.u32 2147483647, %v2581_v29  ;;  %v922_v3 = vmul.f32 %v2523_v37, %v818_v32  ;;  %v2620_v24 = vrot.slane %v354_v46, %v2327_v2  ;;  %v697_v26 = vadd.f32 %v2534_v47, %v585_v30 }
  0xb5   : > { %2057 = vpow2.f32 %v1036_v33  ;;  %v1005_v4 = vsub.f32 0.0, %v973_v34  ;;  %v2593_v45 = vadd.f32 %v923_v35, %v709_v31  ;;  %v696_v31 = vadd.f32 %v2534_v47, %v584_v7 }
  0xb6   : > { %2059 = vpow2.f32 %v1034_v52  ;;  %v1004_v49 = vsub.f32 0.0, %v972_v39  ;;  %v2597_v50 = vadd.f32 %v922_v3, %v708_v36  ;;  %v833_v51 = vpop.permute.xlu1 %832  ;;  %v829_v53 = vpop.permute.xlu0 %828  ;;  %v2625_v10 = vadd.f32 %v2540_v57, %v601_v55 }
  0xb7   : > { %3548 = vst [vmem:[#allocation2_spill] sm:$0xff] %v2593_v45  ;;  %v1040_v40 = vmul.f32 1.442695, %v1005_v4  ;;  %v987_v54 = vand.u32 2147483647, %v2593_v45  ;;  %v925_v56 = vmul.f32 %v2523_v37, %v833_v51  ;;  %v924_v48 = vmul.f32 %v2523_v37, %v829_v53 }
  0xb8   : > { %3549 = vst [vmem:[#allocation3_spill] sm:$0xff] %v2597_v50  ;;  %v1038_v15 = vmul.f32 1.442695, %v1004_v49  ;;  %v986_v8 = vand.u32 2147483647, %v2597_v50  ;;  %v2631_v13 = vadd.f32 %v2540_v57, %v600_v1  ;;  %v2634_v32 = vadd.f32 %v2500_v18, %v587_v5 }
  0xb9   : > { %2061 = vpow2.f32 %v1040_v40  ;;  %v1019_v9 = vsub.f32 0.0, %v987_v54  ;;  %v2607_v12 = vadd.f32 %v925_v56, %v711_v38  ;;  %v2609_v14 = vadd.f32 %v924_v48, %v710_v44 }
  0xba   : > { %2063 = vpow2.f32 %v1038_v15  ;;  %v1018_v17 = vsub.f32 0.0, %v986_v8  ;;  %v458_v19 = vpop.permute.xlu1 %457  ;;  %v454_v21 = vpop.permute.xlu0 %453 }
  0xbb   : > { %3550 = vst [vmem:[#allocation4_spill] sm:$0xff] %v2607_v12  ;;  %3551 = vst [vmem:[#allocation5_spill] sm:$0xff] %v2609_v14  ;;  %v1068_v22 = vmul.f32 1.442695, %v1019_v9  ;;  %v989_v23 = vand.u32 2147483647, %v2607_v12  ;;  %v589_v30 = vmul.f32 %v458_v19, %v2508_v25  ;;  %v588_v4 = vmul.f32 %v454_v21, %v2502_v20 }
  0xbc   : > { %v988_v6 = vand.u32 2147483647, %v2609_v14  ;;  %v1066_v52 = vmul.f32 1.442695, %v1018_v17 }
  0xbd   : > { %v1021_v33 = vsub.f32 0.0, %v989_v23  ;;  %2065 = vpow2.f32 %v1068_v22  ;;  %v2660_v53 = vadd.f32 %v2544_v58, %v589_v30 }
  0xbe   : > { %v1020_v34 = vsub.f32 0.0, %v988_v6  ;;  %v546_v47 = vpop.permute.xlu1 %545  ;;  %v542_v7 = vpop.permute.xlu0 %541  ;;  %2067 = vpow2.f32 %v1066_v52 }
  0xbf   : > { %v2639_v36 = vpop.eup %2057  ;;  %v1072_v44 = vmul.f32 1.442695, %v1021_v33  ;;  %v605_v1 = vmul.f32 %v546_v47, %v2508_v25  ;;  %v604_v9 = vmul.f32 %v542_v7, %v2502_v20 }
  0xc0   : > { %v2644_v18 = vpop.eup %2059  ;;  %v2647_v11 = vadd.f32 1.0, %v2639_v36  ;;  %v2652_v3 = vsel %vm1099_vm2, 1.0, %v2639_v36  ;;  %v1070_v51 = vmul.f32 1.442695, %v1020_v34  ;;  %v1302_v17 = vmul.f32 -0.5, %v2639_v36 }
  0xc1   : > { %3552 = vst [vmem:[#allocation6_spill] sm:$0xff] %v2644_v18  ;;  %3553 = vst [vmem:[#allocation7_spill] sm:$0xff] %v2652_v3  ;;  %v2656_v55 = vadd.f32 1.0, %v2644_v18  ;;  %v1305_v23 = vand.u32 2147483647, %v2639_v36  ;;  %v1293_v52 = vmul.f32 -0.5, %v2644_v18 }
  0xc2   : > { %v756_v40 = vpop.permute.xlu1 %755  ;;  %v752_v54 = vpop.permute.xlu0 %751  ;;  %2069 = vlog2.f32 %v2647_v11 }
  0xc3   : > { %3554 = vst [vmem:[#allocation8_spill] sm:$0xff] %v2656_v55  ;;  %v2663_v48 = vpop.eup %2061  ;;  %v911_v5 = vmul.f32 %v2523_v37, %v756_v40  ;;  %v910_v15 = vmul.f32 %v2523_v37, %v752_v54  ;;  %2071 = vlog2.f32 %v2656_v55  ;;  %v1303_v40 = vadd.f32 1.0, %v1302_v17 }
  0xc4   : > { %v2669_v8 = vpop.eup %2063  ;;  %v2675_v19 = vadd.f32 1.0, %v2663_v48  ;;  %2073 = vpow2.f32 %v1072_v44  ;;  %v1320_v34 = vmul.f32 -0.5, %v2663_v48  ;;  %v2693_v44 = vadd.f32 %v2544_v58, %v588_v4 }
  0xc5   : > { %3555 = vst [vmem:[#allocation9_spill] sm:$0xff] %v2669_v8  ;;  %v2677_v21 = vadd.f32 %v911_v5, %v697_v26  ;;  %v2679_v22 = vadd.f32 %v910_v15, %v696_v31  ;;  %v2686_v30 = vadd.f32 1.0, %v2669_v8  ;;  %v1311_v54 = vmul.f32 -0.5, %v2669_v8 }
  0xc6   : > { %3556 = vst [vmem:[#allocation10_spill] sm:$0xff] %v2675_v19  ;;  %v844_v6 = vpop.permute.xlu1 %843  ;;  %v840_v33 = vpop.permute.xlu0 %839  ;;  %2075 = vlog2.f32 %v2675_v19  ;;  %v2700_v15 = vadd.f32 %v2548_v59, %v605_v1  ;;  %v1294_v39 = vadd.f32 1.0, %v1293_v52  ;;  %v1323_v38 = vand.u32 2147483647, %v2663_v48 }
  0xc7   : > { %3557 = vst [vmem:[#allocation11_spill] sm:$0xff] %v2677_v21  ;;  %3558 = vst [vmem:[#allocation12_spill] sm:$0xff] %v2679_v22  ;;  %v975_v47 = vand.u32 2147483647, %v2677_v21  ;;  %v974_v26 = vand.u32 2147483647, %v2679_v22  ;;  %v927_v31 = vmul.f32 %v2523_v37, %v844_v6  ;;  %v926_v7 = vmul.f32 %v2523_v37, %v840_v33  ;;  %v2697_v5 = vpop.eup %2065 }
  0xc8   : > { %3559 = vst [vmem:[#allocation13_spill] sm:$0xff] %v2686_v30  ;;  %2077 = vlog2.f32 %v2686_v30  ;;  %3560 = vst [vmem:[#allocation14_spill] sm:$0xff] %v2697_v5  ;;  %v1296_v6 = vand.u32 2147483647, %v2644_v18  ;;  %v2707_v33 = vadd.f32 %v2548_v59, %v604_v9  ;;  %vm2713_vm3 = vcmp.lt.f32.partialorder %v1305_v23, 0.0004427343 }
  0xc9   : > { %v1007_v56 = vsub.f32 0.0, %v975_v47  ;;  %v2703_v49 = vadd.f32 %v927_v31, %v2625_v10  ;;  %v1006_v58 = vsub.f32 0.0, %v974_v26  ;;  %2079 = vpow2.f32 %v1070_v51  ;;  %v2717_v47 = vpop.eup %2067 }
  0xca   : > { %v469_v4 = vpop.permute.xlu1 %468  ;;  %v465_v17 = vpop.permute.xlu0 %464  ;;  %v2711_v57 = vadd.f32 %v926_v7, %v2631_v13  ;;  %v1321_v10 = vadd.f32 1.0, %v1320_v34  ;;  %3565 = vst [vmem:[#allocation17_spill] sm:$0xff] %v2717_v47  ;;  %v1304_v9 = vmul.f32 %v2639_v36, %v1303_v40  ;;  %v1312_v26 = vadd.f32 1.0, %v1311_v54 }
  0xcb   : > { %3561 = vst [vmem:[#allocation15_spill] sm:$0xff] %v2703_v49  ;;  %v991_v59 = vand.u32 2147483647, %v2703_v49  ;;  %v2722_v52 = vadd.f32 1.0, %v2697_v5  ;;  %v1044_v51 = vmul.f32 1.442695, %v1007_v56  ;;  %v591_v13 = vmul.f32 %v469_v4, %v2508_v25 }
  0xcc   : > { %3562 = vst [vmem:[#allocation16_spill] sm:$0xff] %v2711_v57  ;;  %v2070_v31 = vpop.eup %2069  ;;  %vm2725_vm4 = vcmp.lt.f32.partialorder %v1296_v6, 0.0004427343  ;;  %v1314_v34 = vand.u32 2147483647, %v2669_v8  ;;  %v1295_v36 = vmul.f32 %v2644_v18, %v1294_v39  ;;  %v590_v6 = vmul.f32 %v465_v17, %v2502_v20 }
  0xcd   : > { %v2072_v7 = vpop.eup %2071  ;;  %v1042_v2 = vmul.f32 1.442695, %v1006_v58  ;;  %v1301_v3 = vmul.f32 0.6931472, %v2070_v31  ;;  %vm2731_vm5 = vcmp.lt.f32.partialorder %v1323_v38, 0.0004427343  ;;  %v1322_v30 = vmul.f32 %v2663_v48, %v1321_v10 }
  0xce   : > { %v557_v35 = vpop.permute.xlu1 %556  ;;  %v553_v46 = vpop.permute.xlu0 %552  ;;  %v990_v54 = vand.u32 2147483647, %v2711_v57  ;;  %v1292_v4 = vmul.f32 0.6931472, %v2072_v7  ;;  %v1023_v58 = vsub.f32 0.0, %v991_v59  ;;  %v1313_v39 = vmul.f32 %v2669_v8, %v1312_v26 }
  0xcf   : > { %v2735_v56 = vpop.eup %2073  ;;  %v1307_v31 = vsel %vm2713_vm3, %v1304_v9, %v1301_v3  ;;  %2081 = vlog2.f32 %v2722_v52  ;;  %v2745_v38 = vadd.f32 %v2552_v60, %v591_v13  ;;  %v3571_v18 = vmax.f32 %v2554_v61, 0.0 }
  0xd0   : > { %3570 = vst [vmem:[#allocation18_spill] sm:$0xff] %v2735_v56  ;;  %v2076_v19 = vpop.eup %2075  ;;  %2083 = vpow2.f32 %v1044_v51  ;;  %vm2749_vm6 = vcmp.lt.f32.partialorder %v1314_v34, 0.0004427343  ;;  %v1298_v3 = vsel %vm2725_vm4, %v1295_v36, %v1292_v4  ;;  %v1446_v26 = vmul.f32 -0.5, %v2697_v5 }
  0xd1   : > { %v1579_v55 = vadd.f32 %v1307_v31, %v3571_v18  ;;  %2085 = vpow2.f32 %v1042_v2  ;;  %v1319_v9 = vmul.f32 0.6931472, %v2076_v19  ;;  %v3574_v61 = vmax.f32 %v2556_v62, 0.0 }
  0xd2   : > { %v2078_v10 = vpop.eup %2077  ;;  %v767_v59 = vpop.permute.xlu1 %766  ;;  %v1076_v2 = vmul.f32 1.442695, %v1023_v58  ;;  %v1022_v7 = vsub.f32 0.0, %v990_v54  ;;  %v2764_v19 = vadd.f32 1.0, %v2717_v47 }
  0xd3   : > { %v763_v1 = vpop.permute.xlu0 %762  ;;  %v913_v51 = vmul.f32 %v2523_v37, %v767_v59  ;;  %1612 = vrot.lane.b32.xlu1 %v1579_v55, %s2274_s5  ;;  %v1578_v18 = vadd.f32 %v1298_v3, %v3574_v61  ;;  %v1310_v34 = vmul.f32 0.6931472, %v2078_v10  ;;  %v1325_v23 = vsel %vm2731_vm5, %v1322_v30, %v1319_v9  ;;  %v2766_v36 = vpop.eup %2079 }
  0xd4   : > { %v912_v13 = vmul.f32 %v2523_v37, %v763_v1  ;;  %3575 = vst [vmem:[#allocation19_spill] sm:$0xff] %v2764_v19  ;;  %3576 = vst [vmem:[#allocation20_spill] sm:$0xff] %v2766_v36  ;;  %v3579_v55 = vmax.f32 %v2579_v28, 0.0  ;;  %v607_v30 = vmul.f32 %v557_v35, %v2508_v25  ;;  %v3580_v59 = vmax.f32 %v2581_v29, 0.0 }
  0xd5   : > { %v2769_v4 = vadd.f32 %v913_v51, %v2634_v32  ;;  %1610 = vrot.lane.b32.xlu0 %v1578_v18, %s2274_s5  ;;  %v1316_v40 = vsel %vm2749_vm6, %v1313_v39, %v1310_v34  ;;  %2087 = vlog2.f32 %v2764_v19  ;;  %v2790_v35 = vadd.f32 %v2552_v60, %v590_v6 }
  0xd6   : > { %v2772_v31 = vadd.f32 %v912_v13, %v2512_v27  ;;  %v1581_v58 = vadd.f32 %v1325_v23, %v3579_v55  ;;  %v855_v54 = vpop.permute.xlu1 %854  ;;  %v1580_v1 = vadd.f32 %v1316_v40, %v3580_v59  ;;  %v1437_v27 = vmul.f32 -0.5, %v2717_v47 }
  0xd7   : > { %3577 = vst [vmem:[#allocation21_spill] sm:$0xff] %v2769_v4  ;;  %v851_v10 = vpop.permute.xlu0 %850  ;;  %v977_v32 = vand.u32 2147483647, %v2769_v4  ;;  %v929_v9 = vmul.f32 %v2523_v37, %v855_v54  ;;  %v1447_v39 = vadd.f32 1.0, %v1446_v26  ;;  %v2793_v51 = vadd.f32 1.0, %v2735_v56 }
  0xd8   : > { %3578 = vst [vmem:[#allocation22_spill] sm:$0xff] %v2772_v31  ;;  %v976_v3 = vand.u32 2147483647, %v2772_v31  ;;  %v928_v17 = vmul.f32 %v2523_v37, %v851_v10  ;;  %1616 = vrot.lane.b32.xlu1 %v1581_v58, %s2274_s5  ;;  %v1464_v13 = vmul.f32 -0.5, %v2735_v56  ;;  %v606_v61 = vmul.f32 %v553_v46, %v2502_v20 }
  0xd9   : > { %3581 = vst [vmem:[#allocation23_spill] sm:$0xff] %v2793_v51  ;;  %v1009_v18 = vsub.f32 0.0, %v977_v32  ;;  %v2798_v34 = vadd.f32 %v929_v9, %v2527_v41  ;;  %1614 = vrot.lane.b32.xlu0 %v1580_v1, %s2274_s5  ;;  %v1449_v23 = vand.u32 2147483647, %v2697_v5  ;;  %v2082_v55 = vpop.eup %2081  ;;  %v1074_v58 = vmul.f32 1.442695, %v1022_v7 }
  0xda   : > { %v1008_v60 = vsub.f32 0.0, %v976_v3  ;;  %v2803_v6 = vadd.f32 %v928_v17, %v2529_v43  ;;  %v480_v26 = vpop.permute.xlu1 %479  ;;  %2089 = vlog2.f32 %v2793_v51  ;;  %v2806_v54 = vpop.eup %2083  ;;  %v2809_v41 = vadd.f32 %v2560_v63, %v607_v30 }
  0xdb   : > { %3582 = vst [vmem:[#allocation24_spill] sm:$0xff] %v2798_v34  ;;  %v476_v40 = vpop.permute.xlu0 %475  ;;  %3584 = vst [vmem:[#allocation26_spill] sm:$0xff] %v2806_v54  ;;  %2091 = vpow2.f32 %v1076_v2  ;;  %v993_v46 = vand.u32 2147483647, %v2798_v34  ;;  %v1438_v10 = vadd.f32 1.0, %v1437_v27  ;;  %v2812_v59 = vpop.eup %2085  ;;  %v1448_v1 = vmul.f32 %v2697_v5, %v1447_v39 }
  0xdc   : > { %3583 = vst [vmem:[#allocation25_spill] sm:$0xff] %v2803_v6  ;;  %3585 = vst [vmem:[#allocation27_spill] sm:$0xff] %v2812_v59  ;;  %v1445_v7 = vmul.f32 0.6931472, %v2082_v55  ;;  %v1440_v43 = vand.u32 2147483647, %v2717_v47  ;;  %v593_v9 = vmul.f32 %v480_v26, %v2508_v25  ;;  %2093 = vpow2.f32 %v1074_v58 }
  0xdd   : > { %v1465_v32 = vadd.f32 1.0, %v1464_v13  ;;  %v1048_v3 = vmul.f32 1.442695, %v1009_v18  ;;  %vm1450_vm7 = vcmp.lt.f32.partialorder %v1449_v23, 0.0004427343  ;;  %v1025_v30 = vsub.f32 0.0, %v993_v46 }
  0xde   : > { %v1467_v2 = vand.u32 2147483647, %v2735_v56  ;;  %v1046_v17 = vmul.f32 1.442695, %v1008_v60  ;;  %v992_v51 = vand.u32 2147483647, %v2803_v6  ;;  %v1451_v19 = vsel %vm1450_vm7, %v1448_v1, %v1445_v7  ;;  %v568_v27 = vpop.permute.xlu1 %567 }
  0xdf   : > { %v564_v8 = vpop.permute.xlu0 %563  ;;  %v2820_v55 = vadd.f32 %v2560_v63, %v606_v61  ;;  %v3586_v39 = vmax.f32 %v2593_v45, 0.0  ;;  %v1439_v18 = vmul.f32 %v2717_v47, %v1438_v10  ;;  %v2088_v26 = vpop.eup %2087  ;;  %v592_v23 = vmul.f32 %v476_v40, %v2502_v20 }
  0xe0   : > { %vm2826_vm8 = vcmp.lt.f32.partialorder %v1440_v43, 0.0004427343  ;;  %v1466_v46 = vmul.f32 %v2735_v56, %v1465_v32  ;;  %v2832_v7 = vadd.f32 1.0, %v2766_v36  ;;  %2095 = vpow2.f32 %v1048_v3 }
  0xe1   : > { %v1595_v13 = vadd.f32 %v1451_v19, %v3586_v39  ;;  %v2835_v63 = vadd.f32 %v2612_v42, %v593_v9  ;;  %v1436_v19 = vmul.f32 0.6931472, %v2088_v26  ;;  %vm2838_vm9 = vcmp.lt.f32.partialorder %v1467_v2, 0.0004427343 }
  0xe2   : > { %3589 = vst [vmem:[#allocation28_spill] sm:$0xff] %v2832_v7  ;;  %2097 = vpow2.f32 %v1046_v17  ;;  %v1080_v58 = vmul.f32 1.442695, %v1025_v30  ;;  %v1024_v40 = vsub.f32 0.0, %v992_v51  ;;  %v778_v10 = vpop.permute.xlu1 %777  ;;  %v2843_v43 = vadd.f32 1.0, %v2806_v54 }
  0xe3   : > { %1644 = vrot.lane.b32.xlu1 %v1595_v13, %s2274_s5  ;;  %v774_v1 = vpop.permute.xlu0 %773  ;;  %v1442_v32 = vsel %vm2826_vm8, %v1439_v18, %v1436_v19  ;;  %2099 = vlog2.f32 %v2832_v7  ;;  %v915_v3 = vmul.f32 %v2523_v37, %v778_v10  ;;  %v3593_v39 = vmax.f32 %v2597_v50, 0.0 }
  0xe4   : > { %3592 = vst [vmem:[#allocation29_spill] sm:$0xff] %v2843_v43  ;;  %v914_v9 = vmul.f32 %v2523_v37, %v774_v1  ;;  %v2090_v2 = vpop.eup %2089  ;;  %v609_v51 = vmul.f32 %v568_v27, %v2508_v25  ;;  %v1455_v30 = vmul.f32 -0.5, %v2766_v36  ;;  %2101 = vlog2.f32 %v2843_v43 }
  0xe5   : > { %v1594_v17 = vadd.f32 %v1442_v32, %v3593_v39  ;;  %v2855_v13 = vpop.eup %2091  ;;  %v608_v18 = vmul.f32 %v564_v8, %v2502_v20  ;;  %v1463_v26 = vmul.f32 0.6931472, %v2090_v2  ;;  %v2859_v60 = vadd.f32 %v915_v3, %v2660_v53 }
  0xe6   : > { %3594 = vst [vmem:[#allocation30_spill] sm:$0xff] %v2855_v13  ;;  %v2862_v19 = vadd.f32 %v914_v9, %v2693_v44  ;;  %v1078_v10 = vmul.f32 1.442695, %v1024_v40  ;;  %v1458_v27 = vand.u32 2147483647, %v2766_v36  ;;  %v866_v1 = vpop.permute.xlu1 %865  ;;  %v1338_v39 = vmul.f32 -0.5, %v2806_v54  ;;  %v2878_v56 = vpop.eup %2093 }
  0xe7   : > { %3595 = vst [vmem:[#allocation31_spill] sm:$0xff] %v2859_v60  ;;  %1642 = vrot.lane.b32.xlu0 %v1594_v17, %s2274_s5  ;;  %v862_v32 = vpop.permute.xlu0 %861  ;;  %v2868_v43 = vadd.f32 1.0, %v2812_v59  ;;  %v1469_v8 = vsel %vm2838_vm9, %v1466_v46, %v1463_v26  ;;  %v979_v53 = vand.u32 2147483647, %v2859_v60  ;;  %v931_v40 = vmul.f32 %v2523_v37, %v866_v1  ;;  %3599 = vst [vmem:[#allocation34_spill] sm:$0xff] %v2878_v56 }
  0xe8   : > { %3596 = vst [vmem:[#allocation32_spill] sm:$0xff] %v2862_v19  ;;  %v978_v44 = vand.u32 2147483647, %v2862_v19  ;;  %2103 = vpow2.f32 %v1080_v58  ;;  %v3598_v3 = vmax.f32 %v2607_v12, 0.0  ;;  %v1456_v2 = vadd.f32 1.0, %v1455_v30 }
  0xe9   : > { %3597 = vst [vmem:[#allocation33_spill] sm:$0xff] %v2868_v43  ;;  %v930_v17 = vmul.f32 %v2523_v37, %v862_v32  ;;  %v2881_v7 = vadd.f32 %v2612_v42, %v592_v23  ;;  %v2884_v46 = vadd.f32 %v931_v40, %v2700_v15  ;;  %2105 = vlog2.f32 %v2868_v43 }
  0xea   : > { %v1597_v9 = vadd.f32 %v1469_v8, %v3598_v3  ;;  %v1329_v61 = vmul.f32 -0.5, %v2812_v59  ;;  %v2889_v58 = vadd.f32 %v2615_v16, %v609_v51  ;;  %v1011_v30 = vsub.f32 0.0, %v979_v53  ;;  %v491_v1 = vpop.permute.xlu1 %490  ;;  %v2895_v23 = vpop.eup %2095 }
  0xeb   : > { %3600 = vst [vmem:[#allocation35_spill] sm:$0xff] %v2884_v46  ;;  %v2893_v26 = vadd.f32 %v930_v17, %v2707_v33  ;;  %v487_v32 = vpop.permute.xlu0 %486  ;;  %v1339_v42 = vadd.f32 1.0, %v1338_v39  ;;  %3601 = vst [vmem:[#allocation36_spill] sm:$0xff] %v2895_v23  ;;  %2107 = vpow2.f32 %v1078_v10  ;;  %v2898_v15 = vadd.f32 %v2615_v16, %v608_v18 }
  0xec   : > { %1648 = vrot.lane.b32.xlu1 %v1597_v9, %s2274_s5  ;;  %v1010_v8 = vsub.f32 0.0, %v978_v44  ;;  %v995_v40 = vand.u32 2147483647, %v2884_v46  ;;  %v2901_v51 = vpop.eup %2097  ;;  %v1457_v3 = vmul.f32 %v2766_v36, %v1456_v2  ;;  %vm2904_vm10 = vcmp.lt.f32.partialorder %v1458_v27, 0.0004427343 }
  0xed   : > { %3602 = vst [vmem:[#allocation37_spill] sm:$0xff] %v2901_v51  ;;  %v1263_v33 = vmax.f32 %v2677_v21, 0.0  ;;  %v1341_v39 = vand.u32 2147483647, %v2806_v54  ;;  %v2100_v9 = vpop.eup %2099  ;;  %v994_v10 = vand.u32 2147483647, %v2893_v26  ;;  %v1340_v27 = vmul.f32 %v2806_v54, %v1339_v42 }
  0xee   : > { %v1262_v16 = vmax.f32 %v2679_v22, 0.0  ;;  %v1330_v18 = vadd.f32 1.0, %v1329_v61  ;;  %v2913_v44 = vadd.f32 1.0, %v2855_v13  ;;  %v2102_v17 = vpop.eup %2101  ;;  %v1454_v43 = vmul.f32 0.6931472, %v2100_v9  ;;  %v579_v12 = vpop.permute.xlu1 %578 }
  0xef   : > { %v1052_v2 = vmul.f32 1.442695, %v1011_v30  ;;  %v1332_v36 = vand.u32 2147483647, %v2812_v59  ;;  %v575_v21 = vpop.permute.xlu0 %574  ;;  %v1050_v47 = vmul.f32 1.442695, %v1010_v8  ;;  %v595_v5 = vmul.f32 %v491_v1, %v2508_v25 }
  0xf0   : > { %3605 = vst [vmem:[#allocation38_spill] sm:$0xff] %v2913_v44  ;;  %v1027_v50 = vsub.f32 0.0, %v995_v40  ;;  %v1337_v45 = vmul.f32 0.6931472, %v2102_v17  ;;  %v1460_v61 = vsel %vm2904_vm10, %v1457_v3, %v1454_v43  ;;  %v2921_v22 = vmul.f32 %v487_v32, %v2502_v20 }
  0xf1   : > { %vm1342_vm11 = vcmp.lt.f32.partialorder %v1341_v39, 0.0004427343  ;;  %2109 = vlog2.f32 %v2913_v44  ;;  %v3606_v30 = vmax.f32 %v2609_v14, 0.0  ;;  %v1026_v9 = vsub.f32 0.0, %v994_v10 }
  0xf2   : > { %v1343_v54 = vsel %vm1342_vm11, %v1340_v27, %v1337_v45  ;;  %v1331_v8 = vmul.f32 %v2812_v59, %v1330_v18  ;;  %v2927_v40 = vpop.eup %2103  ;;  %2111 = vpow2.f32 %v1052_v2  ;;  %vm2929_vm12 = vcmp.lt.f32.partialorder %v1332_v36, 0.0004427343  ;;  %v789_v32 = vpop.permute.xlu1 %788 }
  0xf3   : > { %v1596_v42 = vadd.f32 %v1460_v61, %v3606_v30  ;;  %3607 = vst [vmem:[#allocation39_spill] sm:$0xff] %v2927_v40  ;;  %v1583_v1 = vadd.f32 %v1343_v54, %v1263_v33  ;;  %v1482_v43 = vmul.f32 -0.5, %v2855_v13  ;;  %v785_v3 = vpop.permute.xlu0 %784  ;;  %v2106_v39 = vpop.eup %2105  ;;  %2113 = vpow2.f32 %v1050_v47 }
  0xf4   : > { %v1084_v10 = vmul.f32 1.442695, %v1027_v50  ;;  %v2936_v45 = vadd.f32 %v2620_v24, %v595_v5  ;;  %v2939_v18 = vadd.f32 1.0, %v2878_v56  ;;  %v1328_v36 = vmul.f32 0.6931472, %v2106_v39 }
  0xf5   : > { %1646 = vrot.lane.b32.xlu0 %v1596_v42, %s2274_s5  ;;  %1620 = vrot.lane.b32.xlu1 %v1583_v1, %s2274_s5  ;;  %v2943_v54 = vmul.f32 %v579_v12, %v2508_v25  ;;  %v2946_v33 = vmul.f32 %v575_v21, %v2502_v20  ;;  %v917_v17 = vmul.f32 %v2523_v37, %v789_v32  ;;  %v2949_v2 = vpop.eup %2107  ;;  %v1082_v50 = vmul.f32 1.442695, %v1026_v9 }
  0xf6   : > { %3610 = vst [vmem:[#allocation40_spill] sm:$0xff] %v2939_v18  ;;  %3611 = vst [vmem:[#allocation41_spill] sm:$0xff] %v2949_v2  ;;  %2115 = vlog2.f32 %v2939_v18  ;;  %v1473_v5 = vmul.f32 -0.5, %v2878_v56  ;;  %v916_v47 = vmul.f32 %v2523_v37, %v785_v3  ;;  %v1334_v27 = vsel %vm2929_vm12, %v1331_v8, %v1328_v36  ;;  %v877_v21 = vpop.permute.xlu1 %876 }
  0xf7   : > { %v1279_v25 = vmax.f32 %v2703_v49, 0.0  ;;  %v1483_v12 = vadd.f32 1.0, %v1482_v43  ;;  %v2958_v20 = vadd.f32 %v917_v17, %v2745_v38  ;;  %v873_v61 = vpop.permute.xlu0 %872  ;;  %2117 = vpow2.f32 %v1084_v10 }
  0xf8   : > { %v1582_v30 = vadd.f32 %v1334_v27, %v1262_v16  ;;  %v2961_v42 = vadd.f32 %v916_v47, %v2790_v35  ;;  %v933_v9 = vmul.f32 %v2523_v37, %v877_v21  ;;  %v1485_v1 = vand.u32 2147483647, %v2855_v13 }
  0xf9   : > { %3612 = vst [vmem:[#allocation42_spill] sm:$0xff] %v2958_v20  ;;  %v981_v53 = vand.u32 2147483647, %v2958_v20  ;;  %v932_v8 = vmul.f32 %v2523_v37, %v873_v61  ;;  %v2968_v43 = vadd.f32 1.0, %v2895_v23  ;;  %2119 = vpow2.f32 %v1082_v50 }
  0xfa   : > { %3613 = vst [vmem:[#allocation43_spill] sm:$0xff] %v2961_v42  ;;  %1618 = vrot.lane.b32.xlu0 %v1582_v30, %s2274_s5  ;;  %v1474_v38 = vadd.f32 1.0, %v1473_v5  ;;  %v980_v16 = vand.u32 2147483647, %v2961_v42  ;;  %v2973_v35 = vadd.f32 %v933_v9, %v2809_v41  ;;  %v1484_v3 = vmul.f32 %v2855_v13, %v1483_v12  ;;  %v800_v36 = vpop.permute.xlu1 %799 }
  0xfb   : > { %3614 = vst [vmem:[#allocation44_spill] sm:$0xff] %v2968_v43  ;;  %v2110_v32 = vpop.eup %2109  ;;  %v1013_v39 = vsub.f32 0.0, %v981_v53  ;;  %v2977_v10 = vadd.f32 %v932_v8, %v2820_v55  ;;  %v796_v17 = vpop.permute.xlu0 %795  ;;  %2121 = vlog2.f32 %v2968_v43  ;;  %v919_v27 = vmul.f32 %v2523_v37, %v800_v36 }
  0xfc   : > { %3615 = vst [vmem:[#allocation45_spill] sm:$0xff] %v2973_v35  ;;  %v1481_v50 = vmul.f32 0.6931472, %v2110_v32  ;;  %v1012_v47 = vsub.f32 0.0, %v980_v16  ;;  %v997_v5 = vand.u32 2147483647, %v2973_v35  ;;  %v2982_v21 = vpop.eup %2111  ;;  %v918_v12 = vmul.f32 %v2523_v37, %v796_v17 }
  0xfd   : > { %3616 = vst [vmem:[#allocation46_spill] sm:$0xff] %v2982_v21  ;;  %vm1486_vm13 = vcmp.lt.f32.partialorder %v1485_v1, 0.0004427343  ;;  %v996_v41 = vand.u32 2147483647, %v2977_v10  ;;  %v2987_v55 = vadd.f32 1.0, %v2901_v51  ;;  %v2989_v61 = vpop.eup %2113  ;;  %v2993_v53 = vadd.f32 %v919_v27, %v2835_v63 }
  0xfe   : > { %3618 = vst [vmem:[#allocation48_spill] sm:$0xff] %v2989_v61  ;;  %v1487_v30 = vsel %vm1486_vm13, %v1484_v3, %v1481_v50  ;;  %v1476_v9 = vand.u32 2147483647, %v2878_v56  ;;  %v1356_v8 = vmul.f32 -0.5, %v2895_v23  ;;  %v1056_v32 = vmul.f32 1.442695, %v1013_v39  ;;  %v888_v17 = vpop.permute.xlu1 %887 }
  0xff   : > { %3617 = vst [vmem:[#allocation47_spill] sm:$0xff] %v2987_v55  ;;  %v1599_v16 = vadd.f32 %v1487_v30, %v1279_v25  ;;  %v1029_v1 = vsub.f32 0.0, %v997_v5  ;;  %v2997_v36 = vadd.f32 %v918_v12, %v2881_v7  ;;  %v1278_v59 = vmax.f32 %v2711_v57, 0.0  ;;  %v884_v39 = vpop.permute.xlu0 %883 }
 0x100   : > { %v2116_v13 = vpop.eup %2115  ;;  %v1475_v49 = vmul.f32 %v2878_v56, %v1474_v38  ;;  %v1054_v3 = vmul.f32 1.442695, %v1012_v47  ;;  %v983_v50 = vand.u32 2147483647, %v2993_v53  ;;  %v1028_v27 = vsub.f32 0.0, %v996_v41 }
 0x101   : > { %1652 = vrot.lane.b32.xlu1 %v1599_v16, %s2274_s5  ;;  %v1472_v63 = vmul.f32 0.6931472, %v2116_v13  ;;  %v982_v25 = vand.u32 2147483647, %v2997_v36  ;;  %2123 = vlog2.f32 %v2987_v55  ;;  %v3005_v7 = vpop.eup %2117  ;;  %vm1477_vm14 = vcmp.lt.f32.partialorder %v1476_v9, 0.0004427343 }
 0x102   : > { %3619 = vst [vmem:[#allocation49_spill] sm:$0xff] %v3005_v7  ;;  %v1015_v5 = vsub.f32 0.0, %v983_v50  ;;  %v1265_v12 = vmax.f32 %v2769_v4, 0.0  ;;  %v1357_v30 = vadd.f32 1.0, %v1356_v8  ;;  %2125 = vpow2.f32 %v1056_v32 }
 0x103   : > { %v1478_v38 = vsel %vm1477_vm14, %v1475_v49, %v1472_v63  ;;  %v1088_v47 = vmul.f32 1.442695, %v1029_v1  ;;  %v1359_v56 = vand.u32 2147483647, %v2895_v23  ;;  %v3009_v16 = vpop.eup %2119  ;;  %v1014_v41 = vsub.f32 0.0, %v982_v25  ;;  %v811_v49 = vpop.permute.xlu1 %810 }
 0x104   : > { %v1598_v13 = vadd.f32 %v1478_v38, %v1278_v59  ;;  %v1347_v57 = vmul.f32 -0.5, %v2901_v51  ;;  %v935_v18 = vmul.f32 %v2523_v37, %v888_v17  ;;  %2127 = vpow2.f32 %v1054_v3 }
 0x105   : > { %v2122_v55 = vpop.eup %2121  ;;  %v1086_v9 = vmul.f32 1.442695, %v1028_v27  ;;  %v934_v50 = vmul.f32 %v2523_v37, %v884_v39  ;;  %v3015_v8 = vadd.f32 1.0, %v2927_v40  ;;  %v1060_v32 = vmul.f32 1.442695, %v1015_v5  ;;  %v807_v27 = vpop.permute.xlu0 %806 }
 0x106   : > { %1650 = vrot.lane.b32.xlu0 %v1598_v13, %s2274_s5  ;;  %v1355_v1 = vmul.f32 0.6931472, %v2122_v55  ;;  %v1358_v59 = vmul.f32 %v2895_v23, %v1357_v30  ;;  %v3020_v63 = vadd.f32 %v935_v18, %v2889_v58  ;;  %2129 = vpow2.f32 %v1088_v47 }
 0x107   : > { %3620 = vst [vmem:[#allocation50_spill] sm:$0xff] %v3015_v8  ;;  %vm1360_vm15 = vcmp.lt.f32.partialorder %v1359_v56, 0.0004427343  ;;  %v1350_v17 = vand.u32 2147483647, %v2901_v51  ;;  %v3024_v3 = vadd.f32 %v934_v50, %v2898_v15  ;;  %v1348_v38 = vadd.f32 1.0, %v1347_v57 }
 0x108   : > { %v1058_v25 = vmul.f32 1.442695, %v1014_v41  ;;  %v1361_v39 = vsel %vm1360_vm15, %v1358_v59, %v1355_v1  ;;  %2131 = vlog2.f32 %v3015_v8  ;;  %v706_v55 = vadd.f32 %v2620_v24, %v2921_v22 }
 0x109   : > { %2133 = vpow2.f32 %v1086_v9  ;;  %v1585_v5 = vadd.f32 %v1361_v39, %v1265_v12  ;;  %v3030_v58 = vadd.f32 1.0, %v2949_v2  ;;  %v723_v56 = vadd.f32 %v2628_v0, %v2943_v54  ;;  %v899_v12 = vpop.permute.xlu1 %898  ;;  %v895_v50 = vpop.permute.xlu0 %894 }
 0x10a   : > { %2135 = vpow2.f32 %v1060_v32  ;;  %v999_v15 = vand.u32 2147483647, %v3020_v63  ;;  %v1500_v18 = vmul.f32 -0.5, %v2927_v40  ;;  %v722_v57 = vadd.f32 %v2628_v0, %v2946_v33 }
 0x10b   : > { %3621 = vst [vmem:[#allocation51_spill] sm:$0xff] %v3030_v58  ;;  %v2124_v30 = vpop.eup %2123  ;;  %1624 = vrot.lane.b32.xlu1 %v1585_v5, %s2274_s5  ;;  %v1264_v24 = vmax.f32 %v2772_v31, 0.0  ;;  %v998_v22 = vand.u32 2147483647, %v3024_v3  ;;  %2137 = vlog2.f32 %v3030_v58  ;;  %v1349_v47 = vmul.f32 %v2901_v51, %v1348_v38 }
 0x10c   : > { %2139 = vpow2.f32 %v1058_v25  ;;  %v1346_v54 = vmul.f32 0.6931472, %v2124_v30  ;;  %vm1351_vm0 = vcmp.lt.f32.partialorder %v1350_v17, 0.0004427343  ;;  %v3043_v13 = vpop.eup %2125  ;;  %v1503_v41 = vand.u32 2147483647, %v2927_v40 }
 0x10d   : > { %3622 = vst [vmem:[#allocation52_spill] sm:$0xff] %v3043_v13  ;;  %v1491_v0 = vmul.f32 -0.5, %v2949_v2  ;;  %v921_v33 = vmul.f32 %v2523_v37, %v811_v49  ;;  %v920_v9 = vmul.f32 %v2523_v37, %v807_v27  ;;  %v1031_v1 = vsub.f32 0.0, %v999_v15 }
 0x10e   : > { %v1352_v32 = vsel %vm1351_vm0, %v1349_v47, %v1346_v54  ;;  %v1501_v59 = vadd.f32 1.0, %v1500_v18  ;;  %v937_v25 = vmul.f32 %v2523_v37, %v899_v12  ;;  %v3050_v39 = vpop.eup %2127  ;;  %v1030_v17 = vsub.f32 0.0, %v998_v22 }
 0x10f   : > { %v1584_v38 = vadd.f32 %v1352_v32, %v1264_v24  ;;  %v3053_v5 = vadd.f32 %v921_v33, %v2936_v45  ;;  %v3055_v30 = vadd.f32 %v920_v9, %v706_v55  ;;  %v1494_v51 = vand.u32 2147483647, %v2949_v2 }
 0x110   : > { %v3058_v49 = vadd.f32 %v937_v25, %v723_v56  ;;  %v936_v27 = vmul.f32 %v2523_v37, %v895_v50  ;;  %v3062_v15 = vadd.f32 1.0, %v2982_v21  ;;  %v3064_v18 = vpop.eup %2129  ;;  %v1281_v24 = vmax.f32 %v2798_v34, 0.0 }
 0x111   : > { %1622 = vrot.lane.b32.xlu0 %v1584_v38, %s2274_s5  ;;  %v1492_v22 = vadd.f32 1.0, %v1491_v0  ;;  %v985_v45 = vand.u32 2147483647, %v3053_v5  ;;  %v984_v55 = vand.u32 2147483647, %v3055_v30  ;;  %v1502_v9 = vmul.f32 %v2927_v40, %v1501_v59 }
 0x112   : > { %3623 = vst [vmem:[#allocation53_spill] sm:$0xff] %v3062_v15  ;;  %v2132_v12 = vpop.eup %2131  ;;  %v1092_v54 = vmul.f32 1.442695, %v1031_v1  ;;  %v1001_v56 = vand.u32 2147483647, %v3058_v49  ;;  %v3071_v47 = vadd.f32 %v936_v27, %v722_v57  ;;  %2141 = vlog2.f32 %v3062_v15 }
 0x113   : > { %v3074_v37 = vpop.eup %2133  ;;  %v1499_v33 = vmul.f32 0.6931472, %v2132_v12  ;;  %v1017_v50 = vsub.f32 0.0, %v985_v45  ;;  %v1016_v32 = vsub.f32 0.0, %v984_v55  ;;  %v1090_v25 = vmul.f32 1.442695, %v1030_v17 }
 0x114   : > { %v3077_v0 = vpop.eup %2135  ;;  %vm1504_vm1 = vcmp.lt.f32.partialorder %v1503_v41, 0.0004427343  ;;  %v1280_v38 = vmax.f32 %v2803_v6, 0.0  ;;  %v1374_v1 = vmul.f32 -0.5, %v2982_v21  ;;  %v1493_v27 = vmul.f32 %v2949_v2, %v1492_v22 }
 0x115   : > { %v2138_v34 = vpop.eup %2137  ;;  %v1505_v57 = vsel %vm1504_vm1, %v1502_v9, %v1499_v33  ;;  %v1064_v15 = vmul.f32 1.442695, %v1017_v50  ;;  %v1000_v23 = vand.u32 2147483647, %v3071_v47  ;;  %v1062_v55 = vmul.f32 1.442695, %v1016_v32 }
 0x116   : > { %v3083_v12 = vpop.eup %2139  ;;  %v1601_v59 = vadd.f32 %v1505_v57, %v1281_v24  ;;  %v1490_v45 = vmul.f32 0.6931472, %v2138_v34  ;;  %v1033_v40 = vsub.f32 0.0, %v1001_v56  ;;  %2143 = vpow2.f32 %v1092_v54 }
 0x117   : > { %vm1495_vm2 = vcmp.lt.f32.partialorder %v1494_v51, 0.0004427343  ;;  %v1377_v41 = vand.u32 2147483647, %v2982_v21  ;;  %v3087_v17 = vadd.f32 1.0, %v2989_v61  ;;  %2145 = vpow2.f32 %v1090_v25 }
 0x118   : > { %1656 = vrot.lane.b32.xlu1 %v1601_v59, %s2274_s5  ;;  %v1496_v22 = vsel %vm1495_vm2, %v1493_v27, %v1490_v45  ;;  %v1375_v33 = vadd.f32 1.0, %v1374_v1  ;;  %v3091_v9 = vadd.f32 1.0, %v3005_v7  ;;  %2147 = vpow2.f32 %v1064_v15 }
 0x119   : > { %3624 = vst [vmem:[#allocation54_spill] sm:$0xff] %v3087_v17  ;;  %v1600_v50 = vadd.f32 %v1496_v22, %v1280_v38  ;;  %v1032_v34 = vsub.f32 0.0, %v1000_v23  ;;  %v1267_v24 = vmax.f32 %v2859_v60, 0.0  ;;  %2149 = vpow2.f32 %v1062_v55 }
 0x11a   : > { %3625 = vst [vmem:[#allocation55_spill] sm:$0xff] %v3091_v9  ;;  %v1096_v51 = vmul.f32 1.442695, %v1033_v40  ;;  %v1365_v54 = vmul.f32 -0.5, %v2989_v61  ;;  %v3096_v56 = vadd.f32 1.0, %v3009_v16  ;;  %2151 = vlog2.f32 %v3087_v17 }
 0x11b   : > { %1654 = vrot.lane.b32.xlu0 %v1600_v50, %s2274_s5  ;;  %vm3099_vm3 = vcmp.lt.f32.partialorder %v1377_v41, 0.0004427343  ;;  %v1518_v23 = vmul.f32 -0.5, %v3005_v7  ;;  %v1376_v40 = vmul.f32 %v2982_v21, %v1375_v33  ;;  %v1368_v38 = vand.u32 2147483647, %v2989_v61 }
 0x11c   : > { %v2142_v15 = vpop.eup %2141  ;;  %2153 = vlog2.f32 %v3091_v9  ;;  %v1509_v1 = vmul.f32 -0.5, %v3009_v16  ;;  %v1094_v57 = vmul.f32 1.442695, %v1032_v34  ;;  %v3112_v59 = vadd.f32 1.0, %v3043_v13 }
 0x11d   : > { %v1373_v27 = vmul.f32 0.6931472, %v2142_v15  ;;  %2155 = vlog2.f32 %v3096_v56  ;;  %v1366_v45 = vadd.f32 1.0, %v1365_v54  ;;  %v1283_v55 = vmax.f32 %v2884_v46, 0.0 }
 0x11e   : > { %2157 = vpow2.f32 %v1096_v51  ;;  %v1392_v41 = vmul.f32 -0.5, %v3043_v13  ;;  %v1519_v33 = vadd.f32 1.0, %v1518_v23  ;;  %v1521_v50 = vand.u32 2147483647, %v3005_v7 }
 0x11f   : > { %v1379_v22 = vsel %vm3099_vm3, %v1376_v40, %v1373_v27  ;;  %2159 = vlog2.f32 %v3112_v59  ;;  %v1510_v15 = vadd.f32 1.0, %v1509_v1  ;;  %v1512_v25 = vand.u32 2147483647, %v3009_v16 }
 0x120   : > { %v1587_v34 = vadd.f32 %v1379_v22, %v1267_v24  ;;  %v3122_v21 = vadd.f32 1.0, %v3050_v39  ;;  %v3124_v51 = vpop.eup %2143  ;;  %2161 = vpow2.f32 %v1094_v57  ;;  %vm3126_vm4 = vcmp.lt.f32.partialorder %v1368_v38, 0.0004427343 }
 0x121   : > { %v1395_v32 = vand.u32 2147483647, %v3043_v13  ;;  %v3132_v23 = vadd.f32 1.0, %v3064_v18  ;;  %v3134_v40 = vpop.eup %2145  ;;  %v1367_v24 = vmul.f32 %v2989_v61, %v1366_v45  ;;  %v1282_v1 = vmax.f32 %v2893_v26, 0.0 }
 0x122   : > { %1628 = vrot.lane.b32.xlu1 %v1587_v34, %s2274_s5  ;;  %v1393_v27 = vadd.f32 1.0, %v1392_v41  ;;  %2163 = vlog2.f32 %v3122_v21  ;;  %v3140_v38 = vpop.eup %2147  ;;  %v1520_v57 = vmul.f32 %v3005_v7, %v1519_v33  ;;  %vm3143_vm5 = vcmp.lt.f32.partialorder %v1521_v50, 0.0004427343 }
 0x123   : > { %v1383_v46 = vmul.f32 -0.5, %v3050_v39  ;;  %2165 = vlog2.f32 %v3132_v23  ;;  %v3149_v34 = vpop.eup %2149  ;;  %v1511_v45 = vmul.f32 %v3009_v16, %v1510_v15  ;;  %vm3152_vm6 = vcmp.lt.f32.partialorder %v1512_v25, 0.0004427343 }
 0x124   : > { %v1269_v61 = vmax.f32 %v2958_v20, 0.0  ;;  %v3158_v33 = vadd.f32 1.0, %v3074_v37  ;;  %v2152_v50 = vpop.eup %2151  ;;  %vm3160_vm7 = vcmp.lt.f32.partialorder %v1395_v32, 0.0004427343  ;;  %v1268_v60 = vmax.f32 %v2961_v42, 0.0 }
 0x125   : > { %v1386_v9 = vand.u32 2147483647, %v3050_v39  ;;  %v3167_v15 = vadd.f32 1.0, %v3077_v0  ;;  %v1364_v17 = vmul.f32 0.6931472, %v2152_v50  ;;  %v1394_v2 = vmul.f32 %v3043_v13, %v1393_v27 }
 0x126   : > { %v2154_v25 = vpop.eup %2153  ;;  %v1536_v6 = vmul.f32 -0.5, %v3064_v18  ;;  %2167 = vlog2.f32 %v3158_v33  ;;  %v1384_v4 = vadd.f32 1.0, %v1383_v46  ;;  %v1285_v58 = vmax.f32 %v2973_v35, 0.0 }
 0x127   : > { %v2156_v31 = vpop.eup %2155  ;;  %v1517_v32 = vmul.f32 0.6931472, %v2154_v25  ;;  %2169 = vlog2.f32 %v3167_v15  ;;  %v1370_v43 = vsel %vm3126_vm4, %v1367_v24, %v1364_v17  ;;  %v1539_v50 = vand.u32 2147483647, %v3064_v18 }
 0x128   : > { %v3174_v8 = vpop.eup %2157  ;;  %v1508_v44 = vmul.f32 0.6931472, %v2156_v31  ;;  %v1527_v27 = vmul.f32 -0.5, %v3074_v37  ;;  %v3636_v13 = vmax.f32 %v2862_v19, 0.0  ;;  %v1410_v25 = vmul.f32 -0.5, %v3077_v0 }
 0x129   : > { %v2160_v42 = vpop.eup %2159  ;;  %v1523_v46 = vsel %vm3143_vm5, %v1520_v57, %v1517_v32  ;;  %v3186_v35 = vadd.f32 1.0, %v3083_v12  ;;  %v1537_v54 = vadd.f32 1.0, %v1536_v6  ;;  %vm3193_vm8 = vcmp.lt.f32.partialorder %v1386_v9, 0.0004427343 }
 0x12a   : > { %v1586_v14 = vadd.f32 %v1370_v43, %v3636_v13  ;;  %v1603_v20 = vadd.f32 %v1523_v46, %v1283_v55  ;;  %v1514_v31 = vsel %vm3152_vm6, %v1511_v45, %v1508_v44  ;;  %v1391_v17 = vmul.f32 0.6931472, %v2160_v42  ;;  %v3190_v24 = vpop.eup %2161 }
 0x12b   : > { %v1602_v19 = vadd.f32 %v1514_v31, %v1282_v1  ;;  %v1284_v13 = vmax.f32 %v2977_v10, 0.0  ;;  %2171 = vlog2.f32 %v3186_v35  ;;  %v1385_v6 = vmul.f32 %v3050_v39, %v1384_v4 }
 0x12c   : > { %1626 = vrot.lane.b32.xlu0 %v1586_v14, %s2274_s5  ;;  %v2164_v57 = vpop.eup %2163  ;;  %1660 = vrot.lane.b32.xlu1 %v1603_v20, %s2274_s5  ;;  %v1397_v44 = vsel %vm3160_vm7, %v1394_v2, %v1391_v17  ;;  %v1528_v42 = vadd.f32 1.0, %v1527_v27  ;;  %v1530_v14 = vand.u32 2147483647, %v3074_v37  ;;  %v1411_v22 = vadd.f32 1.0, %v1410_v25 }
 0x12d   : > { %v2166_v55 = vpop.eup %2165  ;;  %v1589_v9 = vadd.f32 %v1397_v44, %v1269_v61  ;;  %v1382_v1 = vmul.f32 0.6931472, %v2164_v57  ;;  %v3205_v45 = vadd.f32 1.0, %v3124_v51  ;;  %v1538_v32 = vmul.f32 %v3064_v18, %v1537_v54 }
 0x12e   : > { %v1535_v41 = vmul.f32 0.6931472, %v2166_v55  ;;  %vm1540_vm9 = vcmp.lt.f32.partialorder %v1539_v50, 0.0004427343  ;;  %v1401_v20 = vmul.f32 -0.5, %v3083_v12  ;;  %v3215_v61 = vadd.f32 1.0, %v3134_v40 }
 0x12f   : > { %v1388_v4 = vsel %vm3193_vm8, %v1385_v6, %v1382_v1  ;;  %v1413_v2 = vand.u32 2147483647, %v3077_v0  ;;  %2173 = vlog2.f32 %v3205_v45  ;;  %vm3218_vm10 = vcmp.lt.f32.partialorder %v1530_v14, 0.0004427343 }
 0x130   : > { %1658 = vrot.lane.b32.xlu0 %v1602_v19, %s2274_s5  ;;  %v2168_v7 = vpop.eup %2167  ;;  %1632 = vrot.lane.b32.xlu1 %v1589_v9, %s2274_s5  ;;  %v1588_v27 = vadd.f32 %v1388_v4, %v1268_v60  ;;  %v1541_v46 = vsel %vm1540_vm9, %v1538_v32, %v1535_v41  ;;  %v1271_v19 = vmax.f32 %v2993_v53, 0.0  ;;  %v1529_v54 = vmul.f32 %v3074_v37, %v1528_v42 }
 0x131   : > { %v2170_v25 = vpop.eup %2169  ;;  %v1605_v31 = vadd.f32 %v1541_v46, %v1285_v58  ;;  %v1526_v17 = vmul.f32 0.6931472, %v2168_v7  ;;  %v1412_v43 = vmul.f32 %v3077_v0, %v1411_v22  ;;  %v1402_v44 = vadd.f32 1.0, %v1401_v20 }
 0x132   : > { %v1409_v57 = vmul.f32 0.6931472, %v2170_v25  ;;  %v1554_v6 = vmul.f32 -0.5, %v3124_v51  ;;  %2175 = vlog2.f32 %v3215_v61  ;;  %vm1414_vm11 = vcmp.lt.f32.partialorder %v1413_v2, 0.0004427343 }
 0x133   : > { %v1532_v60 = vsel %vm3218_vm10, %v1529_v54, %v1526_v17  ;;  %v1404_v14 = vand.u32 2147483647, %v3083_v12  ;;  %v3232_v58 = vadd.f32 1.0, %v3140_v38  ;;  %v1545_v9 = vmul.f32 -0.5, %v3134_v40 }
 0x134   : > { %1630 = vrot.lane.b32.xlu0 %v1588_v27, %s2274_s5  ;;  %1664 = vrot.lane.b32.xlu1 %v1605_v31, %s2274_s5  ;;  %v1604_v42 = vadd.f32 %v1532_v60, %v1284_v13  ;;  %v1415_v55 = vsel %vm1414_vm11, %v1412_v43, %v1409_v57  ;;  %v1403_v32 = vmul.f32 %v3083_v12, %v1402_v44  ;;  %v1555_v20 = vadd.f32 1.0, %v1554_v6 }
 0x135   : > { %v2172_v1 = vpop.eup %2171  ;;  %v1591_v22 = vadd.f32 %v1415_v55, %v1271_v19  ;;  %2177 = vlog2.f32 %v3232_v58  ;;  %v3239_v4 = vadd.f32 1.0, %v3149_v34  ;;  %v1270_v2 = vmax.f32 %v2997_v36, 0.0 }
 0x136   : > { %v1400_v41 = vmul.f32 0.6931472, %v2172_v1  ;;  %vm1405_vm12 = vcmp.lt.f32.partialorder %v1404_v14, 0.0004427343  ;;  %v1557_v13 = vand.u32 2147483647, %v3124_v51  ;;  %v1556_v54 = vmul.f32 %v3124_v51, %v1555_v20 }
 0x137   : > { %v1428_v7 = vmul.f32 -0.5, %v3140_v38  ;;  %v1546_v46 = vadd.f32 1.0, %v1545_v9  ;;  %2179 = vlog2.f32 %v3239_v4  ;;  %v3248_v50 = vadd.f32 1.0, %v3174_v8 }
 0x138   : > { %1662 = vrot.lane.b32.xlu0 %v1604_v42, %s2274_s5  ;;  %1636 = vrot.lane.b32.xlu1 %v1591_v22, %s2274_s5  ;;  %v1406_v27 = vsel %vm1405_vm12, %v1403_v32, %v1400_v41  ;;  %v1287_v31 = vmax.f32 %v3020_v63, 0.0  ;;  %v1548_v43 = vand.u32 2147483647, %v3134_v40  ;;  %vm1558_vm13 = vcmp.lt.f32.partialorder %v1557_v13, 0.0004427343 }
 0x139   : > { %v2174_v19 = vpop.eup %2173  ;;  %v1590_v25 = vadd.f32 %v1406_v27, %v1270_v2  ;;  %2181 = vlog2.f32 %v3248_v50  ;;  %v1429_v57 = vadd.f32 1.0, %v1428_v7  ;;  %v1419_v44 = vmul.f32 -0.5, %v3149_v34  ;;  %v3641_v27 = vld [vmem:[#allocation8_spill] sm:$0xff] }
 0x13a   : > { %v1553_v17 = vmul.f32 0.6931472, %v2174_v19  ;;  %v3257_v6 = vadd.f32 1.0, %v3190_v24  ;;  %v1547_v42 = vmul.f32 %v3134_v40, %v1546_v46  ;;  %v1431_v55 = vand.u32 2147483647, %v3140_v38 }
 0x13b   : > { %v1572_v22 = vmul.f32 -0.5, %v3174_v8  ;;  %v1286_v41 = vmax.f32 %v3024_v3, 0.0  ;;  %vm1549_vm14 = vcmp.lt.f32.partialorder %v1548_v43, 0.0004427343  ;;  %v1422_v32 = vand.u32 2147483647, %v3149_v34 }
 0x13c   : > { %1634 = vrot.lane.b32.xlu0 %v1590_v25, %s2274_s5  ;;  %v2176_v60 = vpop.eup %2175  ;;  %v1559_v14 = vsel %vm1558_vm13, %v1556_v54, %v1553_v17  ;;  %2183 = vlog2.f32 %v3257_v6  ;;  %v1430_v13 = vmul.f32 %v3140_v38, %v1429_v57  ;;  %v1420_v7 = vadd.f32 1.0, %v1419_v44 }
 0x13d   : > { %v1607_v9 = vadd.f32 %v1559_v14, %v1287_v31  ;;  %v1544_v1 = vmul.f32 0.6931472, %v2176_v60  ;;  %2185 = vrcp.f32 %v2647_v11  ;;  %v1563_v25 = vmul.f32 -0.5, %v3190_v24  ;;  %v3642_v31 = vld [vmem:[#allocation10_spill] sm:$0xff]  ;;  %v3643_v11 = vld [vmem:[#allocation13_spill] sm:$0xff] }
 0x13e   : > { %2187 = vrcp.f32 %v3641_v27  ;;  %v1273_v17 = vmax.f32 %v3053_v5, 0.0  ;;  %vm1432_vm15 = vcmp.lt.f32.partialorder %v1431_v55, 0.0004427343  ;;  %v1573_v54 = vadd.f32 1.0, %v1572_v22 }
 0x13f   : > { %v2178_v20 = vpop.eup %2177  ;;  %1668 = vrot.lane.b32.xlu1 %v1607_v9, %s2274_s5  ;;  %v1550_v2 = vsel %vm1549_vm14, %v1547_v42, %v1544_v1  ;;  %2189 = vrcp.f32 %v3642_v31  ;;  %v1575_v57 = vand.u32 2147483647, %v3174_v8  ;;  %v1421_v42 = vmul.f32 %v3149_v34, %v1420_v7 }
 0x140   : > { %v1606_v46 = vadd.f32 %v1550_v2, %v1286_v41  ;;  %v1427_v19 = vmul.f32 0.6931472, %v2178_v20  ;;  %2191 = vrcp.f32 %v3643_v11  ;;  %v1272_v1 = vmax.f32 %v3055_v30, 0.0 }
 0x141   : > { %v2180_v43 = vpop.eup %2179  ;;  %vm1423_vm0 = vcmp.lt.f32.partialorder %v1422_v32, 0.0004427343  ;;  %v1564_v41 = vadd.f32 1.0, %v1563_v25  ;;  %v1574_v20 = vmul.f32 %v3174_v8, %v1573_v54  ;;  %v1566_v2 = vand.u32 2147483647, %v3190_v24 }
 0x142   : > { %1666 = vrot.lane.b32.xlu0 %v1606_v46, %s2274_s5  ;;  %v1433_v60 = vsel %vm1432_vm15, %v1430_v13, %v1427_v19  ;;  %v1418_v14 = vmul.f32 0.6931472, %v2180_v43  ;;  %v1289_v27 = vmax.f32 %v3058_v49, 0.0  ;;  %vm1576_vm1 = vcmp.lt.f32.partialorder %v1575_v57, 0.0004427343 }
 0x143   : > { %v1593_v44 = vadd.f32 %v1433_v60, %v1273_v17  ;;  %v2182_v9 = vpop.eup %2181  ;;  %vm1098_vm2 = vcmp.ge.f32.partialorder %v2556_v62, 0.0  ;;  %vm1101_vm3 = vcmp.ge.f32.partialorder %v2579_v28, 0.0  ;;  %vm1100_vm4 = vcmp.ge.f32.partialorder %v2581_v29, 0.0  ;;  %v3644_v60 = vld [vmem:[#allocation7_spill] sm:$0xff] }
 0x144   : > { %v1424_v55 = vsel %vm1423_vm0, %v1421_v42, %v1418_v14  ;;  %v1571_v22 = vmul.f32 0.6931472, %v2182_v9  ;;  %2193 = vrcp.f32 %v2722_v52  ;;  %v1288_v31 = vmax.f32 %v3071_v47, 0.0  ;;  %v3647_v62 = vld [vmem:[#allocation19_spill] sm:$0xff] }
 0x145   : > { %1640 = vrot.lane.b32.xlu1 %v1593_v44, %s2274_s5  ;;  %v1592_v13 = vadd.f32 %v1424_v55, %v1272_v1  ;;  %v1613_v46 = vpop.permute.xlu1 %1612  ;;  %v1565_v54 = vmul.f32 %v3190_v24, %v1564_v41  ;;  %vm1567_vm5 = vcmp.lt.f32.partialorder %v1566_v2, 0.0004427343  ;;  %vm1706_vm6 = vcmask 523264   ;;  %v3645_v44 = vld [vmem:[#allocation6_spill] sm:$0xff]  ;;  %v3646_v55 = vld [vmem:[#allocation9_spill] sm:$0xff] }
 0x146   : > { %v2184_v7 = vpop.eup %2183  ;;  %v1577_v19 = vsel %vm1576_vm1, %v1574_v20, %v1571_v22  ;;  %v1130_v14 = vsel %vm1098_vm2, 1.0, %v3645_v44  ;;  %v1133_v41 = vsel %vm1101_vm3, 1.0, %v2663_v48  ;;  %v1132_v22 = vsel %vm1100_vm4, 1.0, %v3646_v55 }
 0x147   : > { %v2186_v32 = vpop.eup %2185  ;;  %1638 = vrot.lane.b32.xlu0 %v1592_v13, %s2274_s5  ;;  %v1609_v25 = vadd.f32 %v1577_v19, %v1289_v27  ;;  %v1562_v17 = vmul.f32 0.6931472, %v2184_v7  ;;  %v1611_v11 = vpop.permute.xlu0 %1610  ;;  %2195 = vrcp.f32 %v3647_v62  ;;  %v3652_v62 = vld [vmem:[#allocation17_spill] sm:$0xff]  ;;  %vm1867_vm9 = vcmask 1041409  }
 0x148   : > { %v2188_v43 = vpop.eup %2187  ;;  %v1197_v57 = vmul.f32 %v2186_v32, %v3644_v60  ;;  %vm1122_vm11 = vcmp.ge.f32.partialorder %v2893_v26, 0.0  ;;  %vm1124_vm0 = vcmp.ge.f32.partialorder %v2977_v10, 0.0  ;;  %vm1111_vm1 = vcmp.ge.f32.partialorder %v2993_v53, 0.0 }
 0x149   : > { %v2190_v52 = vpop.eup %2189  ;;  %1672 = vrot.lane.b32.xlu1 %v1609_v25, %s2274_s5  ;;  %v1568_v42 = vsel %vm1567_vm5, %v1565_v54, %v1562_v17  ;;  %v1195_v9 = vmul.f32 %v2188_v43, %v1130_v14  ;;  %v3649_v14 = vld [vmem:[#allocation14_spill] sm:$0xff]  ;;  %vm1110_vm2 = vcmp.ge.f32.partialorder %v2997_v36, 0.0  ;;  %vm1127_vm3 = vcmp.ge.f32.partialorder %v3020_v63, 0.0 }
 0x14a   : > { %v1617_v1 = vpop.permute.xlu1 %1616  ;;  %v2192_v20 = vpop.eup %2191  ;;  %v1608_v2 = vadd.f32 %v1568_v42, %v1288_v31  ;;  %v1675_v13 = vmul.f32 %v1613_v46, %v1197_v57  ;;  %v1201_v27 = vmul.f32 %v2190_v52, %v1133_v41  ;;  %v3648_v57 = vld [vmem:[#allocation2_spill] sm:$0xff]  ;;  %v1159_v53 = vsel %vm1127_vm3, 1.0, %v3124_v51 }
 0x14b   : > { %v1674_v7 = vmul.f32 %v1611_v11, %v1195_v9  ;;  %v1615_v19 = vpop.permute.xlu0 %1614  ;;  %v1199_v32 = vmul.f32 %v2192_v20, %v1132_v22  ;;  %vm1115_vm7 = vcmp.ge.f32.partialorder %v3648_v57, 0.0  ;;  %vm1126_vm4 = vcmp.ge.f32.partialorder %v3024_v3, 0.0 }
 0x14c   : > { %1670 = vrot.lane.b32.xlu0 %v1608_v2, %s2274_s5  ;;  %v1708_v25 = vsel %vm1706_vm6, %v1675_v13, 0.0  ;;  %v1677_v17 = vmul.f32 %v1617_v1, %v1201_v27  ;;  %v1147_v52 = vsel %vm1115_vm7, 1.0, %v3649_v14  ;;  %v3650_v1 = vld [vmem:[#allocation23_spill] sm:$0xff]  ;;  %vm1113_vm5 = vcmp.ge.f32.partialorder %v3053_v5, 0.0 }
 0x14d   : > { %v1707_v28 = vsel %vm1706_vm6, %v1674_v7, 0.0  ;;  %v1676_v48 = vmul.f32 %v1615_v19, %v1199_v32  ;;  %2197 = vrcp.f32 %v3650_v1  ;;  %v3651_v2 = vld [vmem:[#allocation3_spill] sm:$0xff]  ;;  %v3653_v19 = vld [vmem:[#allocation28_spill] sm:$0xff]  ;;  %v1145_v63 = vsel %vm1113_vm5, 1.0, %v3140_v38 }
 0x14e   : > { %v1709_v54 = vadd.f32 %v1708_v25, %v1707_v28  ;;  %v1717_v29 = vsel %vm1706_vm6, %v1677_v17, 0.0  ;;  %v2194_v46 = vpop.eup %2193  ;;  %vm1114_vm8 = vcmp.ge.f32.partialorder %v3651_v2, 0.0  ;;  %2199 = vrcp.f32 %v3653_v19  ;;  %v3659_v2 = vld [vmem:[#allocation20_spill] sm:$0xff] }
 0x14f   : > { %v1716_v31 = vsel %vm1706_vm6, %v1676_v48, 0.0  ;;  %v1229_v42 = vmul.f32 %v2194_v46, %v1147_v52  ;;  %v1146_v7 = vsel %vm1114_vm8, 1.0, %v3652_v62  ;;  %2201 = vrcp.f32 %v3096_v56  ;;  %v3661_v62 = vld [vmem:[#allocation45_spill] sm:$0xff] }
 0x150   : > { %v1710_v43 = vrot.slane %v1709_v54, 4  ;;  %v1718_v60 = vadd.f32 %v1717_v29, %v1716_v31  ;;  %2203 = vrcp.f32 %v3112_v59  ;;  %v3654_v59 = vld [vmem:[#allocation4_spill] sm:$0xff]  ;;  %vm1125_vm15 = vcmp.ge.f32.partialorder %v3661_v62, 0.0 }
 0x151   : > { %v2196_v41 = vpop.eup %2195  ;;  %2205 = vrcp.f32 %v3122_v21  ;;  %vm1117_vm10 = vcmp.ge.f32.partialorder %v3654_v59, 0.0  ;;  %vm1112_vm7 = vcmp.ge.f32.partialorder %v3055_v30, 0.0  ;;  %vm1129_vm8 = vcmp.ge.f32.partialorder %v3058_v49, 0.0  ;;  %v3662_v49 = vld [vmem:[#allocation29_spill] sm:$0xff] }
 0x152   : > { %v1711_v11 = vadd.f32 %v1710_v43, %v1709_v54  ;;  %v1719_v44 = vrot.slane %v1718_v60, 4  ;;  %v1227_v32 = vmul.f32 %v2196_v41, %v1146_v7  ;;  %2207 = vrcp.f32 %v3132_v23 }
 0x153   : > { %2209 = vrcp.f32 %v3158_v33  ;;  %v1154_v33 = vsel %vm1122_vm11, 1.0, %v3009_v16  ;;  %v1144_v3 = vsel %vm1112_vm7, 1.0, %v3149_v34  ;;  %vm1869_vm5 = vcmask 1042434  }
 0x154   : > { %v1712_v55 = vrot.slane %v1711_v11, 2  ;;  %v1720_v22 = vadd.f32 %v1719_v44, %v1718_v60  ;;  %2211 = vrcp.f32 %v3167_v15  ;;  %v3658_v15 = vld [vmem:[#allocation52_spill] sm:$0xff]  ;;  %vm1871_vm7 = vcmask 1043459  }
 0x155   : > { %v1645_v9 = vpop.permute.xlu1 %1644  ;;  %2213 = vrcp.f32 %v3186_v35  ;;  %v3660_v35 = vld [vmem:[#allocation43_spill] sm:$0xff] }
 0x156   : > { %v1691_v20 = vmul.f32 %v1645_v9, %v1229_v42  ;;  %v1713_v13 = vadd.f32 %v1712_v55, %v1711_v11  ;;  %v1721_v27 = vrot.slane %v1720_v22, 2  ;;  %v3655_v11 = vld [vmem:[#allocation18_spill] sm:$0xff]  ;;  %2215 = vrcp.f32 %v3205_v45  ;;  %v3657_v55 = vld [vmem:[#allocation5_spill] sm:$0xff] }
 0x157   : > { %v2198_v56 = vpop.eup %2197  ;;  %v1149_v44 = vsel %vm1117_vm10, 1.0, %v3655_v11  ;;  %v3656_v9 = vld [vmem:[#allocation42_spill] sm:$0xff]  ;;  %vm1116_vm13 = vcmp.ge.f32.partialorder %v3657_v55, 0.0  ;;  %vm1108_vm14 = vcmp.ge.f32.partialorder %v3660_v35, 0.0  ;;  %2217 = vrcp.f32 %v3215_v61 }
 0x158   : > { %v1714_v25 = vrot.slane %v1713_v13, 1  ;;  %v1722_v17 = vadd.f32 %v1721_v27, %v1720_v22  ;;  %v1780_v48 = vsel %vm1706_vm6, %v1691_v20, 0.0  ;;  %v2200_v21 = vpop.eup %2199  ;;  %v1233_v52 = vmul.f32 %v2198_v56, %v1149_v44  ;;  %v3668_v35 = vld [vmem:[#allocation50_spill] sm:$0xff] }
 0x159   : > { %v1643_v28 = vpop.permute.xlu0 %1642  ;;  %v2202_v23 = vpop.eup %2201  ;;  %vm1109_vm12 = vcmp.ge.f32.partialorder %v3656_v9, 0.0  ;;  %v1148_v26 = vsel %vm1116_vm13, 1.0, %v3659_v2  ;;  %v1140_v45 = vsel %vm1108_vm14, 1.0, %v3050_v39  ;;  %2219 = vrcp.f32 %v3232_v58  ;;  %v3666_v2 = vld [vmem:[#allocation47_spill] sm:$0xff] }
 0x15a   : > { %v1690_v54 = vmul.f32 %v1643_v28, %v1227_v32  ;;  %v1723_v29 = vrot.slane %v1722_v17, 1  ;;  %v1715_v46 = vadd.f32 %v1714_v25, %v1713_v13  ;;  %v2204_v1 = vpop.eup %2203  ;;  %v3330_v22 = vmul.f32 %v2202_v23, %v1154_v33 }
 0x15b   : > { %v1141_v20 = vsel %vm1109_vm12, 1.0, %v3658_v15  ;;  %v2206_v16 = vpop.eup %2205  ;;  %v1231_v27 = vmul.f32 %v2200_v21, %v1148_v26  ;;  %2221 = vrcp.f32 %v3239_v4  ;;  %v1158_v11 = vsel %vm1126_vm4, 1.0, %v3134_v40  ;;  %v3663_v15 = vld [vmem:[#allocation33_spill] sm:$0xff]  ;;  %v3667_v26 = vld [vmem:[#allocation40_spill] sm:$0xff] }
 0x15c   : > { %v1779_v31 = vsel %vm1706_vm6, %v1690_v54, 0.0  ;;  %v1724_v43 = vadd.f32 %v1723_v29, %v1722_v17  ;;  %v3334_v13 = vmul.f32 %v2204_v1, %v1141_v20  ;;  %v2208_v7 = vpop.eup %2207  ;;  %v3341_v25 = vmul.f32 %v2206_v16, %v1140_v45  ;;  %v3669_v16 = vld [vmem:[#allocation51_spill] sm:$0xff] }
 0x15d   : > { %v1781_v60 = vadd.f32 %v1780_v48, %v1779_v31  ;;  %v1157_v17 = vsel %vm1125_vm15, 1.0, %v3064_v18  ;;  %v2210_v39 = vpop.eup %2209  ;;  %v1156_v54 = vsel %vm1124_vm0, 1.0, %v3074_v37  ;;  %2223 = vrcp.f32 %v3248_v50 }
 0x15e   : > { %v3319_v57 = vsel %vm1867_vm9, %v1724_v43, %v1715_v46  ;;  %v1649_v14 = vpop.permute.xlu1 %1648  ;;  %v3346_v48 = vmul.f32 %v2208_v7, %v1157_v17  ;;  %v3352_v29 = vmul.f32 %v2210_v39, %v1156_v54  ;;  %2225 = vrcp.f32 %v3257_v6  ;;  %v2212_v18 = vpop.eup %2211  ;;  %v3670_v17 = vld [vmem:[#allocation11_spill] sm:$0xff]  ;;  %v3673_v54 = vld [vmem:[#allocation26_spill] sm:$0xff] }
 0x15f   : > { %v1782_v42 = vrot.slane %v1781_v60, 4  ;;  %v1693_v41 = vmul.f32 %v1649_v14, %v1233_v52  ;;  %v1143_v46 = vsel %vm1111_vm1, 1.0, %v3077_v0  ;;  %v2214_v10 = vpop.eup %2213  ;;  %v1142_v37 = vsel %vm1110_vm2, 1.0, %v3083_v12 }
 0x160   : > { %v3358_v43 = vmul.f32 %v2212_v18, %v1143_v46  ;;  %v2216_v50 = vpop.eup %2215  ;;  %v3362_v56 = vmul.f32 %v2214_v10, %v1142_v37  ;;  %vm1128_vm10 = vcmp.ge.f32.partialorder %v3071_v47, 0.0  ;;  %2227 = vrcp.f32 %v3662_v49  ;;  %v3665_v47 = vld [vmem:[#allocation44_spill] sm:$0xff]  ;;  %v3674_v18 = vld [vmem:[#allocation27_spill] sm:$0xff] }
 0x161   : > { %v1783_v19 = vadd.f32 %v1782_v42, %v1781_v60  ;;  %v1789_v28 = vsel %vm1706_vm6, %v1693_v41, 0.0  ;;  %v3365_v6 = vmul.f32 %v2216_v50, %v1159_v53  ;;  %v2218_v0 = vpop.eup %2217  ;;  %v1161_v42 = vsel %vm1129_vm8, 1.0, %v3174_v8  ;;  %v3664_v8 = vld [vmem:[#allocation38_spill] sm:$0xff]  ;;  %v3676_v10 = vld [vmem:[#allocation16_spill] sm:$0xff] }
 0x162   : > { %v3370_v44 = vmul.f32 %v2218_v0, %v1158_v11  ;;  %v1160_v30 = vsel %vm1128_vm10, 1.0, %v3190_v24  ;;  %2229 = vrcp.f32 %v3663_v15  ;;  %vm1118_vm13 = vcmp.ge.f32.partialorder %v3676_v10, 0.0  ;;  %v3677_v0 = vld [vmem:[#allocation21_spill] sm:$0xff] }
 0x163   : > { %v1784_v4 = vrot.slane %v1783_v19, 2  ;;  %v2220_v12 = vpop.eup %2219  ;;  %2231 = vrcp.f32 %v3664_v8  ;;  %vm1105_vm14 = vcmp.ge.f32.partialorder %v3677_v0, 0.0  ;;  %v3685_v15 = vld [vmem:[#allocation41_spill] sm:$0xff]  ;;  %vm1873_vm8 = vcmask 1044484  }
 0x164   : > { %v3374_v21 = vmul.f32 %v2220_v12, %v1145_v63  ;;  %2233 = vrcp.f32 %v3665_v47  ;;  %v3679_v12 = vld [vmem:[#allocation36_spill] sm:$0xff]  ;;  %v3686_v47 = vld [vmem:[#allocation53_spill] sm:$0xff]  ;;  %vm1875_vm10 = vcmask 1045509  }
 0x165   : > { %v1785_v59 = vadd.f32 %v1784_v4, %v1783_v19  ;;  %v2222_v14 = vpop.eup %2221  ;;  %2235 = vrcp.f32 %v3666_v2  ;;  %v1137_v63 = vsel %vm1105_vm14, 1.0, %v3679_v12  ;;  %v3690_v12 = vld [vmem:[#allocation46_spill] sm:$0xff] }
 0x166   : > { %v3377_v52 = vmul.f32 %v2222_v14, %v1144_v3  ;;  %2237 = vrcp.f32 %v3667_v26  ;;  %v3680_v14 = vld [vmem:[#allocation37_spill] sm:$0xff]  ;;  %v3681_v3 = vld [vmem:[#allocation24_spill] sm:$0xff] }
 0x167   : > { %v1647_v32 = vpop.permute.xlu0 %1646  ;;  %v2224_v40 = vpop.eup %2223  ;;  %v1786_v23 = vrot.slane %v1785_v59, 1  ;;  %2239 = vrcp.f32 %v3668_v35  ;;  %vm1121_vm0 = vcmp.ge.f32.partialorder %v3681_v3, 0.0 }
 0x168   : > { %v1692_v61 = vmul.f32 %v1647_v32, %v1231_v27  ;;  %v2226_v38 = vpop.eup %2225  ;;  %v3382_v33 = vmul.f32 %v2224_v40, %v1161_v42  ;;  %v1621_v20 = vpop.permute.xlu1 %1620  ;;  %2241 = vrcp.f32 %v3669_v16  ;;  %v3682_v40 = vld [vmem:[#allocation25_spill] sm:$0xff] }
 0x169   : > { %v3385_v1 = vmul.f32 %v2226_v38, %v1160_v30  ;;  %v1787_v34 = vadd.f32 %v1786_v23, %v1785_v59  ;;  %v3678_v59 = vld [vmem:[#allocation22_spill] sm:$0xff]  ;;  %vm1120_vm1 = vcmp.ge.f32.partialorder %v3682_v40, 0.0  ;;  %2243 = vrcp.f32 %v3686_v47  ;;  %v3694_v47 = vld [vmem:[#allocation49_spill] sm:$0xff] }
 0x16a   : > { %v1788_v58 = vsel %vm1706_vm6, %v1692_v61, 0.0  ;;  %v2228_v27 = vpop.eup %2227  ;;  %v3672_v61 = vld [vmem:[#allocation15_spill] sm:$0xff]  ;;  %vm1104_vm15 = vcmp.ge.f32.partialorder %v3678_v59, 0.0  ;;  %v1152_v8 = vsel %vm1120_vm1, 1.0, %v3685_v15 }
 0x16b   : > { %v1790_v31 = vadd.f32 %v1789_v28, %v1788_v58  ;;  %v3671_v28 = vld [vmem:[#allocation12_spill] sm:$0xff]  ;;  %vm1119_vm12 = vcmp.ge.f32.partialorder %v3672_v61, 0.0 }
 0x16c   : > { %v1619_v24 = vpop.permute.xlu0 %1618  ;;  %v2230_v62 = vpop.eup %2229  ;;  %vm1102_vm11 = vcmp.ge.f32.partialorder %v3671_v28, 0.0 }
 0x16d   : > { %v1791_v60 = vrot.slane %v1790_v31, 4  ;;  %v2232_v19 = vpop.eup %2231  ;;  %v1134_v4 = vsel %vm1102_vm11, 1.0, %v3674_v18  ;;  %vm1879_vm11 = vcmask 1047559  }
 0x16e   : > { %v2234_v32 = vpop.eup %2233  ;;  %v1203_v53 = vmul.f32 %v2230_v62, %v1134_v4 }
 0x16f   : > { %v1792_v36 = vadd.f32 %v1791_v60, %v1790_v31  ;;  %v2236_v39 = vpop.eup %2235  ;;  %v3675_v31 = vld [vmem:[#allocation30_spill] sm:$0xff]  ;;  %v1209_v38 = vmul.f32 %v2234_v32, %v1137_v63 }
 0x170   : > { %v1151_v46 = vsel %vm1119_vm12, 1.0, %v3675_v31  ;;  %v2238_v50 = vpop.eup %2237  ;;  %v1678_v42 = vmul.f32 %v1619_v24, %v1203_v53  ;;  %v3688_v31 = vld [vmem:[#allocation55_spill] sm:$0xff] }
 0x171   : > { %v1793_v51 = vrot.slane %v1792_v36, 2  ;;  %v2240_v11 = vpop.eup %2239  ;;  %v1237_v2 = vmul.f32 %v2232_v19, %v1151_v46 }
 0x172   : > { %v2242_v23 = vpop.eup %2241  ;;  %v1725_v32 = vsel %vm1706_vm6, %v1678_v42, 0.0 }
 0x173   : > { %v1794_v5 = vadd.f32 %v1793_v51, %v1792_v36  ;;  %v1653_v45 = vpop.permute.xlu1 %1652  ;;  %v1136_v51 = vsel %vm1104_vm15, 1.0, %v3680_v14 }
 0x174   : > { %v1207_v30 = vmul.f32 %v2236_v39, %v1136_v51  ;;  %v3687_v39 = vld [vmem:[#allocation54_spill] sm:$0xff] }
 0x175   : > { %v1795_v9 = vrot.slane %v1794_v5, 1  ;;  %2245 = vrcp.f32 %v3687_v39 }
 0x176   : > { %2247 = vrcp.f32 %v3688_v31 }
 0x177   : > { %v1796_v41 = vadd.f32 %v1795_v9, %v1794_v5  ;;  %v3683_v9 = vld [vmem:[#allocation34_spill] sm:$0xff] }
 0x178   : > { %v1651_v7 = vpop.permute.xlu0 %1650 }
 0x179   : > { %v3388_v55 = vsel %vm1867_vm9, %v1796_v41, %v1787_v34  ;;  %vm1103_vm9 = vcmp.ge.f32.partialorder %v3670_v17, 0.0  ;;  %v1150_v34 = vsel %vm1118_vm13, 1.0, %v3683_v9  ;;  %v3684_v41 = vld [vmem:[#allocation39_spill] sm:$0xff]  ;;  %v1695_v17 = vmul.f32 %v1653_v45, %v1237_v2  ;;  %v3692_v9 = vld [vmem:[#allocation48_spill] sm:$0xff] }
 0x17a   : > { %v1135_v58 = vsel %vm1103_vm9, 1.0, %v3673_v54  ;;  %v1153_v49 = vsel %vm1121_vm0, 1.0, %v3684_v41  ;;  %v1235_v26 = vmul.f32 %v2238_v50, %v1150_v34  ;;  %v2244_v50 = vpop.eup %2243  ;;  %v3693_v41 = vld [vmem:[#allocation35_spill] sm:$0xff]  ;;  %vm1877_vm9 = vcmask 1046534  }
 0x17b   : > { %v1205_v60 = vmul.f32 %v2228_v27, %v1135_v58  ;;  %v1241_v27 = vmul.f32 %v2240_v11, %v1153_v49  ;;  %v1798_v46 = vsel %vm1706_vm6, %v1695_v17, 0.0  ;;  %vm1123_vm4 = vcmp.ge.f32.partialorder %v3693_v41, 0.0 }
 0x17c   : > { %v1694_v28 = vmul.f32 %v1651_v7, %v1235_v26  ;;  %v1155_v2 = vsel %vm1123_vm4, 1.0, %v3694_v47 }
 0x17d   : > { %v1625_v37 = vpop.permute.xlu1 %1624  ;;  %v1679_v5 = vmul.f32 %v1621_v20, %v1205_v60  ;;  %v1239_v20 = vmul.f32 %v2242_v23, %v1152_v8 }
 0x17e   : > { %v1681_v35 = vmul.f32 %v1625_v37, %v1209_v38  ;;  %v1797_v10 = vsel %vm1706_vm6, %v1694_v28, 0.0 }
 0x17f   : > { %v1726_v24 = vsel %vm1706_vm6, %v1679_v5, 0.0  ;;  %v1799_v53 = vadd.f32 %v1798_v46, %v1797_v10  ;;  %v2246_v14 = vpop.eup %2245 }
 0x180   : > { %v1735_v54 = vsel %vm1706_vm6, %v1681_v35, 0.0  ;;  %v1727_v4 = vadd.f32 %v1726_v24, %v1725_v32  ;;  %v2248_v23 = vpop.eup %2247 }
 0x181   : > { %v1800_v3 = vrot.slane %v1799_v53, 4  ;;  %v1245_v35 = vmul.f32 %v2248_v23, %v1155_v2 }
 0x182   : > { %v1728_v60 = vrot.slane %v1727_v4, 4 }
 0x183   : > { %v1623_v36 = vpop.permute.xlu0 %1622  ;;  %v1801_v15 = vadd.f32 %v1800_v3, %v1799_v53 }
 0x184   : > { %v1680_v16 = vmul.f32 %v1623_v36, %v1207_v30  ;;  %v3689_v36 = vld [vmem:[#allocation31_spill] sm:$0xff]  ;;  %v1729_v51 = vadd.f32 %v1728_v60, %v1727_v4  ;;  %v3691_v30 = vld [vmem:[#allocation32_spill] sm:$0xff] }
 0x185   : > { %vm1107_vm2 = vcmp.ge.f32.partialorder %v3689_v36, 0.0  ;;  %vm1106_vm3 = vcmp.ge.f32.partialorder %v3691_v30, 0.0  ;;  %v1802_v28 = vrot.slane %v1801_v15, 2 }
 0x186   : > { %v1734_v58 = vsel %vm1706_vm6, %v1680_v16, 0.0  ;;  %v1139_v63 = vsel %vm1107_vm2, 1.0, %v3690_v12  ;;  %v1138_v34 = vsel %vm1106_vm3, 1.0, %v3692_v9  ;;  %v1730_v49 = vrot.slane %v1729_v51, 2 }
 0x187   : > { %v1736_v37 = vadd.f32 %v1735_v54, %v1734_v58  ;;  %v1213_v40 = vmul.f32 %v2244_v50, %v1139_v63  ;;  %v1211_v8 = vmul.f32 %v2246_v14, %v1138_v34 }
 0x188   : > { %v1731_v17 = vadd.f32 %v1730_v49, %v1729_v51 }
 0x189   : > { %v1737_v0 = vrot.slane %v1736_v37, 4 }
 0x18a   : > { %v1657_v62 = vpop.permute.xlu1 %1656 }
 0x18b   : > { %v1697_v19 = vmul.f32 %v1657_v62, %v1241_v27  ;;  %v1738_v5 = vadd.f32 %v1737_v0, %v1736_v37  ;;  %v1732_v37 = vrot.slane %v1731_v17, 1 }
 0x18d   : > { %v1655_v61 = vpop.permute.xlu0 %1654  ;;  %v1807_v45 = vsel %vm1706_vm6, %v1697_v19, 0.0  ;;  %v1739_v16 = vrot.slane %v1738_v5, 2 }
 0x18e   : > { %v1696_v18 = vmul.f32 %v1655_v61, %v1239_v20 }
 0x18f   : > { %v1740_v58 = vadd.f32 %v1739_v16, %v1738_v5 }
 0x190   : > { %v1806_v7 = vsel %vm1706_vm6, %v1696_v18, 0.0 }
 0x191   : > { %v1808_v59 = vadd.f32 %v1807_v45, %v1806_v7  ;;  %v1803_v45 = vadd.f32 %v1802_v28, %v1801_v15  ;;  %v1741_v0 = vrot.slane %v1740_v58, 1 }
 0x193   : > { %v1809_v42 = vrot.slane %v1808_v59, 4  ;;  %v1804_v51 = vrot.slane %v1803_v45, 1 }
 0x194   : > { %v1629_v11 = vpop.permute.xlu1 %1628 }
 0x195   : > { %v1683_v38 = vmul.f32 %v1629_v11, %v1213_v40  ;;  %v1810_v27 = vadd.f32 %v1809_v42, %v1808_v59  ;;  %v1805_v47 = vadd.f32 %v1804_v51, %v1803_v45 }
 0x197   : > { %v1744_v62 = vsel %vm1706_vm6, %v1683_v38, 0.0  ;;  %v1811_v19 = vrot.slane %v1810_v27, 2  ;;  %v1742_v38 = vadd.f32 %v1741_v0, %v1740_v58 }
 0x199   : > { %v1812_v59 = vadd.f32 %v1811_v19, %v1810_v27 }
 0x19b   : > { %v1813_v30 = vrot.slane %v1812_v59, 1 }
 0x19e   : > { %v1627_v26 = vpop.permute.xlu0 %1626  ;;  %v1661_v24 = vpop.permute.xlu1 %1660 }
 0x19f   : > { %v1682_v20 = vmul.f32 %v1627_v26, %v1211_v8  ;;  %v1699_v32 = vmul.f32 %v1661_v24, %v1245_v35 }
 0x1a1   : > { %v1743_v61 = vsel %vm1706_vm6, %v1682_v20, 0.0  ;;  %v1816_v18 = vsel %vm1706_vm6, %v1699_v32, 0.0  ;;  %v1814_v20 = vadd.f32 %v1813_v30, %v1812_v59 }
 0x1a2   : > { %v1745_v39 = vadd.f32 %v1744_v62, %v1743_v61  ;;  %v1659_v54 = vpop.permute.xlu0 %1658  ;;  %v1633_v31 = vpop.permute.xlu1 %1632  ;;  %v1882_v61 = vsel %vm1869_vm5, %v1805_v47, %v3388_v55 }
 0x1a3   : > { %v1698_v4 = vmul.f32 %v1659_v54, %v3330_v22  ;;  %v1685_v10 = vmul.f32 %v1633_v31, %v3334_v13  ;;  %v1733_v13 = vadd.f32 %v1732_v37, %v1731_v17  ;;  %v1883_v31 = vsel %vm1871_vm7, %v1814_v20, %v1882_v61 }
 0x1a4   : > { %v1746_v46 = vrot.slane %v1745_v39, 4 }
 0x1a5   : > { %v1815_v7 = vsel %vm1706_vm6, %v1698_v4, 0.0  ;;  %v1753_v36 = vsel %vm1706_vm6, %v1685_v10, 0.0  ;;  %v1870_v8 = vsel %vm1869_vm5, %v1733_v13, %v3319_v57 }
 0x1a6   : > { %v1747_v50 = vadd.f32 %v1746_v46, %v1745_v39  ;;  %v1817_v60 = vadd.f32 %v1816_v18, %v1815_v7  ;;  %v1631_v53 = vpop.permute.xlu0 %1630  ;;  %v1665_v12 = vpop.permute.xlu1 %1664 }
 0x1a7   : > { %v1684_v11 = vmul.f32 %v1631_v53, %v3341_v25  ;;  %v1701_v14 = vmul.f32 %v1665_v12, %v3346_v48 }
 0x1a8   : > { %v1748_v63 = vrot.slane %v1747_v50, 2  ;;  %v1818_v22 = vrot.slane %v1817_v60, 4 }
 0x1a9   : > { %v1752_v3 = vsel %vm1706_vm6, %v1684_v11, 0.0  ;;  %v1825_v9 = vsel %vm1706_vm6, %v1701_v14, 0.0 }
 0x1aa   : > { %v1749_v40 = vadd.f32 %v1748_v63, %v1747_v50  ;;  %v1819_v23 = vadd.f32 %v1818_v22, %v1817_v60  ;;  %v1754_v5 = vadd.f32 %v1753_v36, %v1752_v3  ;;  %v1663_v42 = vpop.permute.xlu0 %1662  ;;  %v1637_v34 = vpop.permute.xlu1 %1636 }
 0x1ab   : > { %v1700_v25 = vmul.f32 %v1663_v42, %v3352_v29  ;;  %v1687_v15 = vmul.f32 %v1637_v34, %v3358_v43  ;;  %v1872_v29 = vsel %vm1871_vm7, %v1742_v38, %v1870_v8 }
 0x1ac   : > { %v1750_v41 = vrot.slane %v1749_v40, 1  ;;  %v1820_v49 = vrot.slane %v1819_v23, 2  ;;  %v1755_v48 = vrot.slane %v1754_v5, 4 }
 0x1ad   : > { %v1824_v2 = vsel %vm1706_vm6, %v1700_v25, 0.0  ;;  %v1762_v24 = vsel %vm1706_vm6, %v1687_v15, 0.0 }
 0x1ae   : > { %v1751_v26 = vadd.f32 %v1750_v41, %v1749_v40  ;;  %v1821_v35 = vadd.f32 %v1820_v49, %v1819_v23  ;;  %v1756_v16 = vadd.f32 %v1755_v48, %v1754_v5  ;;  %v1826_v27 = vadd.f32 %v1825_v9, %v1824_v2  ;;  %v1635_v62 = vpop.permute.xlu0 %1634 }
 0x1af   : > { %v1686_v32 = vmul.f32 %v1635_v62, %v3362_v56 }
 0x1b0   : > { %v1874_v43 = vsel %vm1873_vm8, %v1751_v26, %v1872_v29  ;;  %v1822_v17 = vrot.slane %v1821_v35, 1  ;;  %v1757_v57 = vrot.slane %v1756_v16, 2  ;;  %v1827_v28 = vrot.slane %v1826_v27, 4 }
 0x1b1   : > { %v1761_v39 = vsel %vm1706_vm6, %v1686_v32, 0.0  ;;  %v1669_v4 = vpop.permute.xlu1 %1668 }
 0x1b2   : > { %v1823_v54 = vadd.f32 %v1822_v17, %v1821_v35  ;;  %v1758_v58 = vadd.f32 %v1757_v57, %v1756_v16  ;;  %v1828_v19 = vadd.f32 %v1827_v28, %v1826_v27  ;;  %v1763_v18 = vadd.f32 %v1762_v24, %v1761_v39 }
 0x1b3   : > { %v1703_v46 = vmul.f32 %v1669_v4, %v3365_v6 }
 0x1b4   : > { %v1884_v56 = vsel %vm1873_vm8, %v1823_v54, %v1883_v31  ;;  %v1759_v10 = vrot.slane %v1758_v58, 1  ;;  %v1829_v37 = vrot.slane %v1828_v19, 2  ;;  %v1764_v45 = vrot.slane %v1763_v18, 4  ;;  %v1667_v55 = vpop.permute.xlu0 %1666 }
 0x1b5   : > { %v1834_v7 = vsel %vm1706_vm6, %v1703_v46, 0.0  ;;  %v1702_v0 = vmul.f32 %v1667_v55, %v3370_v44 }
 0x1b6   : > { %v1760_v50 = vadd.f32 %v1759_v10, %v1758_v58  ;;  %v1830_v60 = vadd.f32 %v1829_v37, %v1828_v19  ;;  %v1765_v53 = vadd.f32 %v1764_v45, %v1763_v18 }
 0x1b7   : > { %v1833_v6 = vsel %vm1706_vm6, %v1702_v0, 0.0  ;;  %v1641_v12 = vpop.permute.xlu1 %1640 }
 0x1b8   : > { %v1876_v59 = vsel %vm1875_vm10, %v1760_v50, %v1874_v43  ;;  %v1831_v36 = vrot.slane %v1830_v60, 1  ;;  %v1766_v11 = vrot.slane %v1765_v53, 2  ;;  %v1835_v63 = vadd.f32 %v1834_v7, %v1833_v6 }
 0x1b9   : > { %v1689_v22 = vmul.f32 %v1641_v12, %v3374_v21  ;;  %v1639_v3 = vpop.permute.xlu0 %1638 }
 0x1ba   : > { %v1832_v14 = vadd.f32 %v1831_v36, %v1830_v60  ;;  %v1767_v13 = vadd.f32 %v1766_v11, %v1765_v53  ;;  %v1836_v51 = vrot.slane %v1835_v63, 4  ;;  %v1688_v44 = vmul.f32 %v1639_v3, %v3377_v52 }
 0x1bb   : > { %v1771_v5 = vsel %vm1706_vm6, %v1689_v22, 0.0  ;;  %v1673_v38 = vpop.permute.xlu1 %1672 }
 0x1bc   : > { %v1885_v40 = vsel %vm1875_vm10, %v1832_v14, %v1884_v56  ;;  %v1768_v23 = vrot.slane %v1767_v13, 1  ;;  %v1837_v42 = vadd.f32 %v1836_v51, %v1835_v63  ;;  %v1770_v9 = vsel %vm1706_vm6, %v1688_v44, 0.0 }
 0x1bd   : > { %v1705_v25 = vmul.f32 %v1673_v38, %v3382_v33  ;;  %v1772_v34 = vadd.f32 %v1771_v5, %v1770_v9 }
 0x1be   : > { %v1769_v30 = vadd.f32 %v1768_v23, %v1767_v13  ;;  %v1838_v21 = vrot.slane %v1837_v42, 2  ;;  %v1671_v49 = vpop.permute.xlu0 %1670 }
 0x1bf   : > { %v1773_v15 = vrot.slane %v1772_v34, 4  ;;  %v1843_v8 = vsel %vm1706_vm6, %v1705_v25, 0.0  ;;  %v1704_v52 = vmul.f32 %v1671_v49, %v3385_v1 }
 0x1c0   : > { %v1878_v41 = vsel %vm1877_vm9, %v1769_v30, %v1876_v59  ;;  %v1839_v48 = vadd.f32 %v1838_v21, %v1837_v42 }
 0x1c1   : > { %v1774_v2 = vadd.f32 %v1773_v15, %v1772_v34  ;;  %v1842_v26 = vsel %vm1706_vm6, %v1704_v52, 0.0 }
 0x1c2   : > { %v1840_v47 = vrot.slane %v1839_v48, 1  ;;  %v1844_v35 = vadd.f32 %v1843_v8, %v1842_v26 }
 0x1c3   : > { %v1775_v27 = vrot.slane %v1774_v2, 2 }
 0x1c4   : > { %v1841_v16 = vadd.f32 %v1840_v47, %v1839_v48  ;;  %v1845_v33 = vrot.slane %v1844_v35, 4 }
 0x1c5   : > { %v1776_v29 = vadd.f32 %v1775_v27, %v1774_v2 }
 0x1c6   : > { %v1886_v62 = vsel %vm1877_vm9, %v1841_v16, %v1885_v40  ;;  %v1846_v20 = vadd.f32 %v1845_v33, %v1844_v35 }
 0x1c7   : > { %v1777_v24 = vrot.slane %v1776_v29, 1 }
 0x1c8   : > { %v1847_v32 = vrot.slane %v1846_v20, 2 }
 0x1c9   : > { %v1778_v1 = vadd.f32 %v1777_v24, %v1776_v29 }
 0x1ca   : > { %v1848_v43 = vadd.f32 %v1847_v32, %v1846_v20 }
 0x1cb   : > { %v1880_v17 = vsel %vm1879_vm11, %v1778_v1, %v1878_v41 }
 0x1cc   : > { %1890 = vst.msk [vmem:[%s291_s8] sm:$0xff] %vm1706_vm6, %v1880_v17  ;;  %v1849_v57 = vrot.slane %v1848_v43, 1 }
 0x1ce   : > { %v1850_v28 = vadd.f32 %v1849_v57, %v1848_v43 }
 0x1d0   : > { %v1887_v61 = vsel %vm1879_vm11, %v1850_v28, %v1886_v62 }
 0x1d1   : > { %1891 = vst.msk [vmem:[%s291_s8 + $0x8] sm:$0xff] %vm1706_vm6, %v1887_v61 }
 0x1d2 PF: > { %s14_s17 = sadd.s32 1, %s2271_s17   ;;  %s3695_s15 = smov %s2267_s16 }
 0x1d3   : > { %p11_p5 = scmp.ge.s32.totalorder %s14_s17, 4   ;;  %s3696_s16 = smov %s3698_s18 }
 0x1d5   :  { %13 = sbr.rel (!%p11_p5) target bundleno = 2 (0x2), region = 72 }

</bundles_post_ra>
